<compile_context>
chip_gen: v7x
topology: tpu7x:2x2x1
jax: 0.10.0
libtpu: 0.0.40
codegen_flags: <defaults>
</compile_context>

<pallas_src>
import functools

import jax
import jax.numpy as jnp
from jax.experimental import pallas as pl
from jax.experimental.pallas import tpu as pltpu

EPS = 1e-5
NEG_SLOPE = 0.1

# MXU input dtype (f32 accumulation). Set to jnp.float32 for exact f32 math.
MXU_INPUT_DTYPE = jnp.bfloat16

# 48 MiB: below v7x's 64 MiB-per-TC physical VMEM, generous on v5e/v6e (128 MiB).
_VMEM_LIMIT_BYTES = 48 * 1024 * 1024
# Keep the whole conv weight resident in VMEM (single HBM fetch) up to this size.
_WEIGHT_RESIDENT_BYTES = 8 * 1024 * 1024


def _leaky(x):
    return jnp.where(x >= 0, x, NEG_SLOPE * x)


def _ds(start, size, stride):
    return pl.ds(start, size) if stride == 1 else pl.ds(start, size, stride)


def _cout_tile(cout, k_elems, itemsize):
    # Full weight resident in VMEM when it fits the budget -> fetched once for
    # the whole grid instead of N*(Cout/Tc) times.
    if k_elems * cout * itemsize <= _WEIGHT_RESIDENT_BYTES:
        return cout
    for t in (256, 128):     # 256 keeps the v6e/v7x 256-wide MXU full
        if cout % t == 0:
            return t
    return cout


def _row_chunk(ho, wo, tc):
    # Output rows per chunk: the per-chunk f32 accumulator lives in vregs, so
    # bound rows*tc*4B to ~128 KiB (and <=512 flattened rows).
    rows_limit = max(8, min(512, (128 * 1024) // (4 * max(tc, 1))))
    best = 1
    for hc in range(1, ho + 1):
        if ho % hc == 0 and hc * wo <= rows_limit:
            best = hc
    return best


def _fill_padded(pad_ref, value):
    # Write `value` (R, C, K) into the interior of the (R+2, C+2, K) scratch
    # with a zero halo.  Only the top/bottom halo rows are stored separately;
    # the left/right halo columns are built into the single interior store
    # (no full-buffer zero fill, every store is sublane-aligned).
    r, c, k = value.shape
    zrow = jnp.zeros((1, c + 2, k), pad_ref.dtype)
    pad_ref[0:1, :, :] = zrow
    pad_ref[r + 1:r + 2, :, :] = zrow
    vf = value.astype(jnp.float32)
    zcol = jnp.zeros((r, 1, k), jnp.float32)
    body = jnp.concatenate([zcol, vf, zcol], axis=1)      # (R, C+2, K)
    pad_ref[1:r + 1, :, :] = body.astype(pad_ref.dtype)


# ----------------------------- Pallas kernels ------------------------------

def fused_conv1_kernel(x_ref, s1_ref, t1_ref, w1_ref, b1_ref, s2_ref, t2_ref,
                       a2_ref, xpad_ref, *, stride, ho, wo, hc, mxu_dtype):
    # x_ref: (H, W, Cin); s1/t1: (1, Cin); w1: (3, 3, Cin, Tc); b1/s2/t2: (1, Tc)
    # a2_ref (out): (Ho*Wo, Tc); xpad_ref: (H+2, W+2, Cin) scratch.
    cin = x_ref.shape[-1]

    # Prologue once per image: the x block and the scratch persist across the
    # cout-tile axis j (its index_map ignores j, and j is "arbitrary").
    @pl.when(pl.program_id(1) == 0)
    def _():
        a1 = _leaky(x_ref[...].astype(jnp.float32) * s1_ref[...] + t1_ref[...])
        _fill_padded(xpad_ref, a1)

    # 3x3 (strided) conv in output-row chunks: the 9 taps accumulate in a
    # local f32 value (first tap initializes), then conv bias + folded BN2 +
    # leaky ReLU is applied and the chunk is stored flat as (rows, Tc).
    for h0 in range(0, ho, hc):
        acc = None
        for kh in range(3):
            for kw in range(3):
                patch = xpad_ref[_ds(h0 * stride + kh, hc, stride),
                                 _ds(kw, wo, stride), :]
                d = jnp.dot(patch.reshape(hc * wo, cin).astype(mxu_dtype),
                            w1_ref[kh, kw],
                            preferred_element_type=jnp.float32)
                acc = d if acc is None else acc + d
        a2 = _leaky((acc + b1_ref[...]) * s2_ref[...] + t2_ref[...])
        a2_ref[pl.ds(h0 * wo, hc * wo), :] = a2.astype(a2_ref.dtype)


def fused_conv2_residual_kernel(a2_ref, w2_ref, b2_ref, x_ref, s1_ref, t1_ref,
                                *rest, has_skip, act_before, stride, ho, wo,
                                hc, mxu_dtype):
    # a2_ref: (Ho*Wo, Cmid); w2: (3, 3, Cmid, Tc); b2: (1, Tc)
    # x_ref: (H, W, Cin) [skip-conv path] or (Ho, Wo, Tc) [identity path]
    if has_skip:
        wsk_ref, bsk_ref, o_ref, a2pad_ref = rest
    else:
        o_ref, a2pad_ref = rest
    cmid = a2_ref.shape[-1]

    # Stage conv2's input (already bn2+leaky'd by kernel 1) once per image.
    @pl.when(pl.program_id(1) == 0)
    def _():
        _fill_padded(a2pad_ref, a2_ref[...].reshape(ho, wo, cmid))

    for h0 in range(0, ho, hc):
        acc = None
        for kh in range(3):
            for kw in range(3):
                patch = a2pad_ref[pl.ds(h0 + kh, hc), pl.ds(kw, wo), :]
                d = jnp.dot(patch.reshape(hc * wo, cmid).astype(mxu_dtype),
                            w2_ref[kh, kw],
                            preferred_element_type=jnp.float32)
                acc = d if acc is None else acc + d
        y = acc + b2_ref[...]

        # Fused residual epilogue for this row chunk.
        if has_skip:
            cin = x_ref.shape[-1]
            x0 = x_ref[_ds(h0 * stride, hc, stride),
                       _ds(0, wo, stride), :].astype(jnp.float32)
            if act_before:
                x0 = _leaky(x0 * s1_ref[...] + t1_ref[...])
            res = jnp.dot(x0.reshape(hc * wo, cin).astype(mxu_dtype),
                          wsk_ref[...],
                          preferred_element_type=jnp.float32) + bsk_ref[...]
        else:
            x0 = x_ref[pl.ds(h0, hc), :, :].astype(jnp.float32)
            if act_before:
                x0 = _leaky(x0 * s1_ref[...] + t1_ref[...])
            res = x0.reshape(hc * wo, x_ref.shape[-1])

        o_ref[pl.ds(h0 * wo, hc * wo), :] = (y + res).astype(o_ref.dtype)


# ------------------------------ Pallas wrappers -----------------------------

def _compiler_params():
    # The cout-tile axis must be sequential ("arbitrary") so the
    # pl.when(program_id(1) == 0) prologue is guaranteed to have run before
    # the later cout tiles of the same image read the pad scratch.
    return pltpu.CompilerParams(
        dimension_semantics=("parallel", "arbitrary"),
        vmem_limit_bytes=_VMEM_LIMIT_BYTES)


def _fused_bn_conv1_bn(x, s1, t1, w1, b1, s2, t2, stride, mxu_dtype):
    n, h, wd, cin = x.shape
    cout = w1.shape[-1]
    ho = (h - 1) // stride + 1
    wo = (wd - 1) // stride + 1
    isz = jnp.finfo(mxu_dtype).bits // 8
    tc = _cout_tile(cout, 9 * cin, isz)
    hc = _row_chunk(ho, wo, tc)
    # bf16 pad scratch for stride-1; keep f32 for strided sublane tap reads.
    pad_dtype = mxu_dtype if stride == 1 else jnp.float32
    cost = pl.CostEstimate(
        flops=int(2 * n * ho * wo * 9 * cin * cout),
        transcendentals=0,
        bytes_accessed=int(x.size * x.dtype.itemsize
                           + 9 * cin * cout * isz
                           + n * ho * wo * cout * isz))
    kern = functools.partial(fused_conv1_kernel, stride=stride, ho=ho, wo=wo,
                             hc=hc, mxu_dtype=mxu_dtype)
    return pl.pallas_call(
        kern,
        out_shape=jax.ShapeDtypeStruct((n, ho * wo, cout), mxu_dtype),
        grid=(n, cout // tc),
        in_specs=[
            pl.BlockSpec((None, h, wd, cin), lambda i, j: (i, 0, 0, 0)),
            pl.BlockSpec((1, cin), lambda i, j: (0, 0)),
            pl.BlockSpec((1, cin), lambda i, j: (0, 0)),
            pl.BlockSpec((3, 3, cin, tc), lambda i, j: (0, 0, 0, j)),
            pl.BlockSpec((1, tc), lambda i, j: (0, j)),
            pl.BlockSpec((1, tc), lambda i, j: (0, j)),
            pl.BlockSpec((1, tc), lambda i, j: (0, j)),
        ],
        out_specs=pl.BlockSpec((None, ho * wo, tc), lambda i, j: (i, 0, j)),
        scratch_shapes=[pltpu.VMEM((h + 2, wd + 2, cin), pad_dtype)],
        compiler_params=_compiler_params(),
        cost_estimate=cost,
    )(x, s1.reshape(1, cin), t1.reshape(1, cin), w1.astype(mxu_dtype),
      b1.reshape(1, cout), s2.reshape(1, cout), t2.reshape(1, cout))


def _fused_conv2_residual(a2, w2, b2, x, s1, t1, wsk, bsk, stride, act_before,
                          mxu_dtype, ho, wo):
    n = x.shape[0]
    hx, wx, cin = x.shape[1], x.shape[2], x.shape[3]
    cmid = a2.shape[-1]
    cout = w2.shape[-1]
    has_skip = wsk is not None
    isz = jnp.finfo(mxu_dtype).bits // 8
    tc = _cout_tile(cout, 9 * cmid, isz)
    hc = _row_chunk(ho, wo, tc)

    in_specs = [
        pl.BlockSpec((None, ho * wo, cmid), lambda i, j: (i, 0, 0)),
        pl.BlockSpec((3, 3, cmid, tc), lambda i, j: (0, 0, 0, j)),
        pl.BlockSpec((1, tc), lambda i, j: (0, j)),
    ]
    if has_skip:
        in_specs += [
            pl.BlockSpec((None, hx, wx, cin), lambda i, j: (i, 0, 0, 0)),
            pl.BlockSpec((1, cin), lambda i, j: (0, 0)),
            pl.BlockSpec((1, cin), lambda i, j: (0, 0)),
            pl.BlockSpec((cin, tc), lambda i, j: (0, j)),
            pl.BlockSpec((1, tc), lambda i, j: (0, j)),
        ]
        args = (a2, w2.astype(mxu_dtype), b2.reshape(1, cout), x,
                s1.reshape(1, cin), t1.reshape(1, cin),
                wsk.astype(mxu_dtype), bsk.reshape(1, cout))
        skip_flops = 2 * n * ho * wo * cin * cout
    else:
        in_specs += [
            pl.BlockSpec((None, hx, wx, tc), lambda i, j: (i, 0, 0, j)),
            pl.BlockSpec((1, tc), lambda i, j: (0, j)),
            pl.BlockSpec((1, tc), lambda i, j: (0, j)),
        ]
        args = (a2, w2.astype(mxu_dtype), b2.reshape(1, cout), x,
                s1.reshape(1, cin), t1.reshape(1, cin))
        skip_flops = 0

    cost = pl.CostEstimate(
        flops=int(2 * n * ho * wo * 9 * cmid * cout + skip_flops),
        transcendentals=0,
        bytes_accessed=int(a2.size * isz + 9 * cmid * cout * isz
                           + x.size * x.dtype.itemsize
                           + n * ho * wo * cout * 4))
    kern = functools.partial(
        fused_conv2_residual_kernel, has_skip=has_skip, act_before=act_before,
        stride=stride, ho=ho, wo=wo, hc=hc, mxu_dtype=mxu_dtype)
    return pl.pallas_call(
        kern,
        out_shape=jax.ShapeDtypeStruct((n, ho * wo, cout), x.dtype),
        grid=(n, cout // tc),
        in_specs=in_specs,
        out_specs=pl.BlockSpec((None, ho * wo, tc), lambda i, j: (i, 0, j)),
        scratch_shapes=[pltpu.VMEM((ho + 2, wo + 2, cmid), mxu_dtype)],
        compiler_params=_compiler_params(),
        cost_estimate=cost,
    )(*args)


# ------------------------------ Residual module -----------------------------

def _fold_bn(bn):
    scale = bn["gamma"] * jax.lax.rsqrt(bn["var"] + EPS)
    shift = bn["beta"] - bn["mean"] * scale
    return scale, shift


def residual_forward(x_nchw, params, stride, activate_before_residual=False,
                     mxu_dtype=MXU_INPUT_DTYPE):
    x = jnp.transpose(x_nchw, (0, 2, 3, 1))  # NCHW -> NHWC (C -> lanes)
    n, h, wd, cin = x.shape
    cout = params["w1"].shape[-1]
    ho = (h - 1) // stride + 1
    wo = (wd - 1) // stride + 1

    s1, t1 = _fold_bn(params["bn1"])
    s2, t2 = _fold_bn(params["bn2"])

    # Kernel 1: leaky(bn2(conv1(leaky(bn1(x)))))  (flat (Ho*Wo, Cout) layout)
    a2 = _fused_bn_conv1_bn(x, s1, t1, params["w1"], params["b1"], s2, t2,
                            stride, mxu_dtype)

    wsk = params.get("w_skip")
    bsk = params.get("b_skip")
    if wsk is None:
        assert stride == 1 and cin == cout, "identity skip requires stride=1"

    # Kernel 2: conv2(a2) + skip(x0), skip = identity or fused 1x1 conv.
    out = _fused_conv2_residual(a2, params["w2"], params["b2"], x, s1, t1,
                                wsk, bsk, stride, activate_before_residual,
                                mxu_dtype, ho, wo)
    out = out.reshape(n, ho, wo, cout)        # free metadata reshape in XLA
    return jnp.transpose(out, (0, 3, 1, 2))   # NHWC -> NCHW


# ------------------------------ Pure-JAX reference ---------------------------

def residual_reference(x_nchw, params, stride, activate_before_residual=False,
                       conv_input_dtype=jnp.float32):
    # conv_input_dtype rounds conv/matmul inputs like the kernel's MXU path.
    def conv(x, w, b, s, padding):
        xd = x.astype(conv_input_dtype).astype(jnp.float32)
        wd_ = w.astype(conv_input_dtype).astype(jnp.float32)
        y = jax.lax.conv_general_dilated(
            xd, wd_, (s, s), padding,
            dimension_numbers=("NHWC", "HWIO", "NHWC"),
            precision=jax.lax.Precision.HIGHEST)
        return y + b.reshape(1, 1, 1, -1)

    x = jnp.transpose(x_nchw, (0, 2, 3, 1))
    s1, t1 = _fold_bn(params["bn1"])
    s2, t2 = _fold_bn(params["bn2"])
    a1 = _leaky(x * s1 + t1)
    x0 = a1 if activate_before_residual else x
    c1 = conv(a1, params["w1"], params["b1"], stride, [(1, 1), (1, 1)])
    a2 = _leaky(c1 * s2 + t2).astype(conv_input_dtype).astype(jnp.float32)
    c2 = conv(a2, params["w2"], params["b2"], 1, [(1, 1), (1, 1)])
    if "w_skip" in params:
        cin, cout = params["w_skip"].shape
        x0 = conv(x0, params["w_skip"].reshape(1, 1, cin, cout),
                  params["b_skip"], stride, [(0, 0), (0, 0)])
    return jnp.transpose(x0 + c2, (0, 3, 1, 2))


# ---------------------------------- main -------------------------------------

def make_params(key, cin, cout):
    ks = jax.random.split(key, 14)
    params = {
        "bn1": {
            "gamma": 1.0 + 0.1 * jax.random.normal(ks[0], (cin,), jnp.float32),
            "beta": 0.1 * jax.random.normal(ks[1], (cin,), jnp.float32),
            "mean": 0.1 * jax.random.normal(ks[2], (cin,), jnp.float32),
            "var": 1.0 + 0.1 * jnp.abs(jax.random.normal(ks[3], (cin,), jnp.float32)),
        },
        "w1": 0.1 * jax.random.normal(ks[4], (3, 3, cin, cout), jnp.float32),
        "b1": 0.1 * jax.random.normal(ks[5], (cout,), jnp.float32),
        "bn2": {
            "gamma": 1.0 + 0.1 * jax.random.normal(ks[6], (cout,), jnp.float32),
            "beta": 0.1 * jax.random.normal(ks[7], (cout,), jnp.float32),
            "mean": 0.1 * jax.random.normal(ks[8], (cout,), jnp.float32),
            "var": 1.0 + 0.1 * jnp.abs(jax.random.normal(ks[9], (cout,), jnp.float32)),
        },
        "w2": 0.1 * jax.random.normal(ks[10], (3, 3, cout, cout), jnp.float32),
        "b2": 0.1 * jax.random.normal(ks[11], (cout,), jnp.float32),
    }
    if cin != cout:
        params["w_skip"] = 0.1 * jax.random.normal(ks[12], (cin, cout), jnp.float32)
        params["b_skip"] = 0.1 * jax.random.normal(ks[13], (cout,), jnp.float32)
    return params


def _check(out, x, params, stride, act_before):
    ref_matched = residual_reference(x, params, stride, act_before,
                                     conv_input_dtype=MXU_INPUT_DTYPE)
    ref_f32 = residual_reference(x, params, stride, act_before)
    # Tight check vs a reference whose matmul inputs are rounded like the MXU
    # path (bf16 inputs, f32 accumulation); loose sanity check vs pure f32.
    assert jnp.allclose(out, ref_matched, atol=1e-2, rtol=1e-2), "mismatch (matched ref)"
    assert jnp.allclose(out, ref_f32, atol=5e-2, rtol=5e-2), "mismatch (f32 ref)"


if __name__ == "__main__":
    key = jax.random.PRNGKey(0)
    k_x1, k_p1, k_x2, k_p2 = jax.random.split(key, 4)

    # Case 1: channel change + stride 2 -> fused 1x1-conv skip path.
    N, C_IN, C_OUT, H, W, STRIDE, ACT = 2, 4, 8, 16, 16, 2, False
    x1 = jax.random.normal(k_x1, (N, C_IN, H, W), jnp.float32)  # PyTorch NCHW
    p1 = make_params(k_p1, C_IN, C_OUT)
    out1 = jax.block_until_ready(residual_forward(x1, p1, STRIDE, ACT))
    assert out1.shape == (N, C_OUT, H // STRIDE, W // STRIDE)
    _check(out1, x1, p1, STRIDE, ACT)

    # Case 2: same channels, stride 1 -> identity skip, activate_before_residual.
    C2 = 8
    x2 = jax.random.normal(k_x2, (N, C2, H, W), jnp.float32)
    p2 = make_params(k_p2, C2, C2)
    out2 = jax.block_until_ready(residual_forward(x2, p2, 1, True))
    assert out2.shape == (N, C2, H, W)
    _check(out2, x2, p2, 1, True)

    print("KERNEL_OK")
</pallas_src>

<mosaic_0001>
module attributes {stable_mosaic.version = 11 : i64} {
  func.func @fused_conv1_kernel(%arg0: i32, %arg1: i32, %arg2: memref<1x16x16x4xf32, #tpu.memory_space<vmem>>, %arg3: memref<1x4xf32, #tpu.memory_space<vmem>>, %arg4: memref<1x4xf32, #tpu.memory_space<vmem>>, %arg5: memref<3x3x4x8xbf16, #tpu.memory_space<vmem>>, %arg6: memref<1x8xf32, #tpu.memory_space<vmem>>, %arg7: memref<1x8xf32, #tpu.memory_space<vmem>>, %arg8: memref<1x8xf32, #tpu.memory_space<vmem>>, %arg9: memref<1x64x8xbf16, #tpu.memory_space<vmem>>, %arg10: memref<18x18x4xf32, #tpu.memory_space<vmem>>) attributes {dimension_semantics = [#tpu.dimension_semantics<parallel>, #tpu.dimension_semantics<arbitrary>], iteration_bounds = array<i64: 2, 1>, scalar_prefetch = 0 : i64, scratch_operands = 1 : i64, tpu.core_type = #tpu.core_type<tc>, window_params = [{transform_indices = @transform_0, window_bounds = array<i64: 1, 16, 16, 4>}, {pipeline_mode = #tpu.pipeline_mode<synchronous>, transform_indices = @transform_1, window_bounds = array<i64: 1, 4>}, {pipeline_mode = #tpu.pipeline_mode<synchronous>, transform_indices = @transform_2, window_bounds = array<i64: 1, 4>}, {transform_indices = @transform_3, window_bounds = array<i64: 3, 3, 4, 8>}, {transform_indices = @transform_4, window_bounds = array<i64: 1, 8>}, {transform_indices = @transform_5, window_bounds = array<i64: 1, 8>}, {transform_indices = @transform_6, window_bounds = array<i64: 1, 8>}, {transform_indices = @transform_7, window_bounds = array<i64: 1, 64, 8>}]} {
    %c0_i32 = arith.constant 0 : i32
    %0 = arith.cmpi eq, %arg1, %c0_i32 : i32
    %1 = arith.extui %0 : i1 to i32
    %c0_i32_0 = arith.constant 0 : i32
    %2 = arith.cmpi ne, %1, %c0_i32_0 : i32
    scf.if %2 {
      %c0_80 = arith.constant 0 : index
      %c0_81 = arith.constant 0 : index
      %c0_82 = arith.constant 0 : index
      %c0_83 = arith.constant 0 : index
      %83 = vector.load %arg2[%c0_80, %c0_81, %c0_82, %c0_83] : memref<1x16x16x4xf32, #tpu.memory_space<vmem>>, vector<1x16x16x4xf32>
      %84 = vector.shape_cast %83 : vector<1x16x16x4xf32> to vector<16x16x4xf32>
      %c0_84 = arith.constant 0 : index
      %c0_85 = arith.constant 0 : index
      %85 = vector.load %arg3[%c0_84, %c0_85] : memref<1x4xf32, #tpu.memory_space<vmem>>, vector<1x4xf32>
      %86 = vector.shape_cast %85 : vector<1x4xf32> to vector<1x1x4xf32>
      %87 = vector.broadcast %86 : vector<1x1x4xf32> to vector<16x16x4xf32>
      %88 = arith.mulf %84, %87 : vector<16x16x4xf32>
      %c0_86 = arith.constant 0 : index
      %c0_87 = arith.constant 0 : index
      %89 = vector.load %arg4[%c0_86, %c0_87] : memref<1x4xf32, #tpu.memory_space<vmem>>, vector<1x4xf32>
      %90 = vector.shape_cast %89 : vector<1x4xf32> to vector<1x1x4xf32>
      %91 = vector.broadcast %90 : vector<1x1x4xf32> to vector<16x16x4xf32>
      %92 = arith.addf %88, %91 : vector<16x16x4xf32>
      %cst_88 = arith.constant 0.000000e+00 : f32
      %93 = vector.broadcast %cst_88 : f32 to vector<16x16x4xf32>
      %94 = arith.cmpf oge, %92, %93 : vector<16x16x4xf32>
      %cst_89 = arith.constant 1.000000e-01 : f32
      %95 = vector.broadcast %cst_89 : f32 to vector<16x16x4xf32>
      %96 = arith.mulf %95, %92 : vector<16x16x4xf32>
      %97 = arith.select %94, %92, %96 : vector<16x16x4xi1>, vector<16x16x4xf32>
      %cst_90 = arith.constant 0.000000e+00 : f32
      %98 = vector.broadcast %cst_90 : f32 to vector<1x18x4xf32>
      %c0_91 = arith.constant 0 : index
      %c0_92 = arith.constant 0 : index
      %c0_93 = arith.constant 0 : index
      %99 = vector.load %arg10[%c0_91, %c0_92, %c0_93] : memref<18x18x4xf32, #tpu.memory_space<vmem>>, vector<1x18x4xf32>
      tpu.vector_store %arg10[%c0_91, %c0_92, %c0_93], %98 {strides = array<i32>} : memref<18x18x4xf32, #tpu.memory_space<vmem>>, vector<1x18x4xf32>,
      %c17 = arith.constant 17 : index
      %c0_94 = arith.constant 0 : index
      %c0_95 = arith.constant 0 : index
      %100 = vector.load %arg10[%c17, %c0_94, %c0_95] : memref<18x18x4xf32, #tpu.memory_space<vmem>>, vector<1x18x4xf32>
      tpu.vector_store %arg10[%c17, %c0_94, %c0_95], %98 {strides = array<i32>} : memref<18x18x4xf32, #tpu.memory_space<vmem>>, vector<1x18x4xf32>,
      %cst_96 = arith.constant 0.000000e+00 : f32
      %101 = vector.broadcast %cst_96 : f32 to vector<16x1x4xf32>
      %102 = tpu.concatenate %101, %97, %101 in 1 : vector<16x1x4xf32>, vector<16x16x4xf32>, vector<16x1x4xf32> -> vector<16x18x4xf32>
      %c1_97 = arith.constant 1 : index
      %c0_98 = arith.constant 0 : index
      %c0_99 = arith.constant 0 : index
      %103 = vector.load %arg10[%c1_97, %c0_98, %c0_99] : memref<18x18x4xf32, #tpu.memory_space<vmem>>, vector<16x18x4xf32>
      tpu.vector_store %arg10[%c1_97, %c0_98, %c0_99], %102 {strides = array<i32>} : memref<18x18x4xf32, #tpu.memory_space<vmem>>, vector<16x18x4xf32>,
    } else {
    }
    %c0 = arith.constant 0 : index
    %c0_1 = arith.constant 0 : index
    %c0_2 = arith.constant 0 : index
    %3 = tpu.strided_load %arg10[%c0, %c0_1, %c0_2] {strides = array<i32: 2, 2, 1>} : memref<18x18x4xf32, #tpu.memory_space<vmem>>, vector<8x8x4xf32>
    %4 = vector.shape_cast %3 : vector<8x8x4xf32> to vector<64x4xf32>
    %5 = arith.truncf %4 : vector<64x4xf32> to vector<64x4xbf16>
    %c0_3 = arith.constant 0 : index
    %c0_4 = arith.constant 0 : index
    %c0_5 = arith.constant 0 : index
    %c0_6 = arith.constant 0 : index
    %6 = vector.load %arg5[%c0_3, %c0_4, %c0_5, %c0_6] : memref<3x3x4x8xbf16, #tpu.memory_space<vmem>>, vector<1x1x4x8xbf16>
    %7 = vector.shape_cast %6 : vector<1x1x4x8xbf16> to vector<4x8xbf16>
    %cst = arith.constant dense<0.000000e+00> : vector<64x8xf32>
    %8 = tpu.matmul %5, %7, %cst {dimension_numbers = #tpu.dot_dimension_numbers<[1], [0], [0], [1], [0, 0, 1, 1], [], []>} : vector<64x4xbf16>, vector<4x8xbf16>, vector<64x8xf32> -> vector<64x8xf32>
    %c0_7 = arith.constant 0 : index
    %c1 = arith.constant 1 : index
    %c0_8 = arith.constant 0 : index
    %9 = tpu.strided_load %arg10[%c0_7, %c1, %c0_8] {strides = array<i32: 2, 2, 1>} : memref<18x18x4xf32, #tpu.memory_space<vmem>>, vector<8x8x4xf32>
    %10 = vector.shape_cast %9 : vector<8x8x4xf32> to vector<64x4xf32>
    %11 = arith.truncf %10 : vector<64x4xf32> to vector<64x4xbf16>
    %c0_9 = arith.constant 0 : index
    %c1_10 = arith.constant 1 : index
    %c0_11 = arith.constant 0 : index
    %c0_12 = arith.constant 0 : index
    %12 = vector.load %arg5[%c0_9, %c1_10, %c0_11, %c0_12] : memref<3x3x4x8xbf16, #tpu.memory_space<vmem>>, vector<1x1x4x8xbf16>
    %13 = vector.shape_cast %12 : vector<1x1x4x8xbf16> to vector<4x8xbf16>
    %cst_13 = arith.constant dense<0.000000e+00> : vector<64x8xf32>
    %14 = tpu.matmul %11, %13, %cst_13 {dimension_numbers = #tpu.dot_dimension_numbers<[1], [0], [0], [1], [0, 0, 1, 1], [], []>} : vector<64x4xbf16>, vector<4x8xbf16>, vector<64x8xf32> -> vector<64x8xf32>
    %15 = arith.addf %8, %14 : vector<64x8xf32>
    %c0_14 = arith.constant 0 : index
    %c2 = arith.constant 2 : index
    %c0_15 = arith.constant 0 : index
    %16 = tpu.strided_load %arg10[%c0_14, %c2, %c0_15] {strides = array<i32: 2, 2, 1>} : memref<18x18x4xf32, #tpu.memory_space<vmem>>, vector<8x8x4xf32>
    %17 = vector.shape_cast %16 : vector<8x8x4xf32> to vector<64x4xf32>
    %18 = arith.truncf %17 : vector<64x4xf32> to vector<64x4xbf16>
    %c0_16 = arith.constant 0 : index
    %c2_17 = arith.constant 2 : index
    %c0_18 = arith.constant 0 : index
    %c0_19 = arith.constant 0 : index
    %19 = vector.load %arg5[%c0_16, %c2_17, %c0_18, %c0_19] : memref<3x3x4x8xbf16, #tpu.memory_space<vmem>>, vector<1x1x4x8xbf16>
    %20 = vector.shape_cast %19 : vector<1x1x4x8xbf16> to vector<4x8xbf16>
    %cst_20 = arith.constant dense<0.000000e+00> : vector<64x8xf32>
    %21 = tpu.matmul %18, %20, %cst_20 {dimension_numbers = #tpu.dot_dimension_numbers<[1], [0], [0], [1], [0, 0, 1, 1], [], []>} : vector<64x4xbf16>, vector<4x8xbf16>, vector<64x8xf32> -> vector<64x8xf32>
    %22 = arith.addf %15, %21 : vector<64x8xf32>
    %c1_21 = arith.constant 1 : index
    %c0_22 = arith.constant 0 : index
    %c0_23 = arith.constant 0 : index
    %23 = tpu.strided_load %arg10[%c1_21, %c0_22, %c0_23] {strides = array<i32: 2, 2, 1>} : memref<18x18x4xf32, #tpu.memory_space<vmem>>, vector<8x8x4xf32>
    %24 = vector.shape_cast %23 : vector<8x8x4xf32> to vector<64x4xf32>
    %25 = arith.truncf %24 : vector<64x4xf32> to vector<64x4xbf16>
    %c1_24 = arith.constant 1 : index
    %c0_25 = arith.constant 0 : index
    %c0_26 = arith.constant 0 : index
    %c0_27 = arith.constant 0 : index
    %26 = vector.load %arg5[%c1_24, %c0_25, %c0_26, %c0_27] : memref<3x3x4x8xbf16, #tpu.memory_space<vmem>>, vector<1x1x4x8xbf16>
    %27 = vector.shape_cast %26 : vector<1x1x4x8xbf16> to vector<4x8xbf16>
    %cst_28 = arith.constant dense<0.000000e+00> : vector<64x8xf32>
    %28 = tpu.matmul %25, %27, %cst_28 {dimension_numbers = #tpu.dot_dimension_numbers<[1], [0], [0], [1], [0, 0, 1, 1], [], []>} : vector<64x4xbf16>, vector<4x8xbf16>, vector<64x8xf32> -> vector<64x8xf32>
    %29 = arith.addf %22, %28 : vector<64x8xf32>
    %c1_29 = arith.constant 1 : index
    %c1_30 = arith.constant 1 : index
    %c0_31 = arith.constant 0 : index
    %30 = tpu.strided_load %arg10[%c1_29, %c1_30, %c0_31] {strides = array<i32: 2, 2, 1>} : memref<18x18x4xf32, #tpu.memory_space<vmem>>, vector<8x8x4xf32>
    %31 = vector.shape_cast %30 : vector<8x8x4xf32> to vector<64x4xf32>
    %32 = arith.truncf %31 : vector<64x4xf32> to vector<64x4xbf16>
    %c1_32 = arith.constant 1 : index
    %c1_33 = arith.constant 1 : index
    %c0_34 = arith.constant 0 : index
    %c0_35 = arith.constant 0 : index
    %33 = vector.load %arg5[%c1_32, %c1_33, %c0_34, %c0_35] : memref<3x3x4x8xbf16, #tpu.memory_space<vmem>>, vector<1x1x4x8xbf16>
    %34 = vector.shape_cast %33 : vector<1x1x4x8xbf16> to vector<4x8xbf16>
    %cst_36 = arith.constant dense<0.000000e+00> : vector<64x8xf32>
    %35 = tpu.matmul %32, %34, %cst_36 {dimension_numbers = #tpu.dot_dimension_numbers<[1], [0], [0], [1], [0, 0, 1, 1], [], []>} : vector<64x4xbf16>, vector<4x8xbf16>, vector<64x8xf32> -> vector<64x8xf32>
    %36 = arith.addf %29, %35 : vector<64x8xf32>
    %c1_37 = arith.constant 1 : index
    %c2_38 = arith.constant 2 : index
    %c0_39 = arith.constant 0 : index
    %37 = tpu.strided_load %arg10[%c1_37, %c2_38, %c0_39] {strides = array<i32: 2, 2, 1>} : memref<18x18x4xf32, #tpu.memory_space<vmem>>, vector<8x8x4xf32>
    %38 = vector.shape_cast %37 : vector<8x8x4xf32> to vector<64x4xf32>
    %39 = arith.truncf %38 : vector<64x4xf32> to vector<64x4xbf16>
    %c1_40 = arith.constant 1 : index
    %c2_41 = arith.constant 2 : index
    %c0_42 = arith.constant 0 : index
    %c0_43 = arith.constant 0 : index
    %40 = vector.load %arg5[%c1_40, %c2_41, %c0_42, %c0_43] : memref<3x3x4x8xbf16, #tpu.memory_space<vmem>>, vector<1x1x4x8xbf16>
    %41 = vector.shape_cast %40 : vector<1x1x4x8xbf16> to vector<4x8xbf16>
    %cst_44 = arith.constant dense<0.000000e+00> : vector<64x8xf32>
    %42 = tpu.matmul %39, %41, %cst_44 {dimension_numbers = #tpu.dot_dimension_numbers<[1], [0], [0], [1], [0, 0, 1, 1], [], []>} : vector<64x4xbf16>, vector<4x8xbf16>, vector<64x8xf32> -> vector<64x8xf32>
    %43 = arith.addf %36, %42 : vector<64x8xf32>
    %c2_45 = arith.constant 2 : index
    %c0_46 = arith.constant 0 : index
    %c0_47 = arith.constant 0 : index
    %44 = tpu.strided_load %arg10[%c2_45, %c0_46, %c0_47] {strides = array<i32: 2, 2, 1>} : memref<18x18x4xf32, #tpu.memory_space<vmem>>, vector<8x8x4xf32>
    %45 = vector.shape_cast %44 : vector<8x8x4xf32> to vector<64x4xf32>
    %46 = arith.truncf %45 : vector<64x4xf32> to vector<64x4xbf16>
    %c2_48 = arith.constant 2 : index
    %c0_49 = arith.constant 0 : index
    %c0_50 = arith.constant 0 : index
    %c0_51 = arith.constant 0 : index
    %47 = vector.load %arg5[%c2_48, %c0_49, %c0_50, %c0_51] : memref<3x3x4x8xbf16, #tpu.memory_space<vmem>>, vector<1x1x4x8xbf16>
    %48 = vector.shape_cast %47 : vector<1x1x4x8xbf16> to vector<4x8xbf16>
    %cst_52 = arith.constant dense<0.000000e+00> : vector<64x8xf32>
    %49 = tpu.matmul %46, %48, %cst_52 {dimension_numbers = #tpu.dot_dimension_numbers<[1], [0], [0], [1], [0, 0, 1, 1], [], []>} : vector<64x4xbf16>, vector<4x8xbf16>, vector<64x8xf32> -> vector<64x8xf32>
    %50 = arith.addf %43, %49 : vector<64x8xf32>
    %c2_53 = arith.constant 2 : index
    %c1_54 = arith.constant 1 : index
    %c0_55 = arith.constant 0 : index
    %51 = tpu.strided_load %arg10[%c2_53, %c1_54, %c0_55] {strides = array<i32: 2, 2, 1>} : memref<18x18x4xf32, #tpu.memory_space<vmem>>, vector<8x8x4xf32>
    %52 = vector.shape_cast %51 : vector<8x8x4xf32> to vector<64x4xf32>
    %53 = arith.truncf %52 : vector<64x4xf32> to vector<64x4xbf16>
    %c2_56 = arith.constant 2 : index
    %c1_57 = arith.constant 1 : index
    %c0_58 = arith.constant 0 : index
    %c0_59 = arith.constant 0 : index
    %54 = vector.load %arg5[%c2_56, %c1_57, %c0_58, %c0_59] : memref<3x3x4x8xbf16, #tpu.memory_space<vmem>>, vector<1x1x4x8xbf16>
    %55 = vector.shape_cast %54 : vector<1x1x4x8xbf16> to vector<4x8xbf16>
    %cst_60 = arith.constant dense<0.000000e+00> : vector<64x8xf32>
    %56 = tpu.matmul %53, %55, %cst_60 {dimension_numbers = #tpu.dot_dimension_numbers<[1], [0], [0], [1], [0, 0, 1, 1], [], []>} : vector<64x4xbf16>, vector<4x8xbf16>, vector<64x8xf32> -> vector<64x8xf32>
    %57 = arith.addf %50, %56 : vector<64x8xf32>
    %c2_61 = arith.constant 2 : index
    %c2_62 = arith.constant 2 : index
    %c0_63 = arith.constant 0 : index
    %58 = tpu.strided_load %arg10[%c2_61, %c2_62, %c0_63] {strides = array<i32: 2, 2, 1>} : memref<18x18x4xf32, #tpu.memory_space<vmem>>, vector<8x8x4xf32>
    %59 = vector.shape_cast %58 : vector<8x8x4xf32> to vector<64x4xf32>
    %60 = arith.truncf %59 : vector<64x4xf32> to vector<64x4xbf16>
    %c2_64 = arith.constant 2 : index
    %c2_65 = arith.constant 2 : index
    %c0_66 = arith.constant 0 : index
    %c0_67 = arith.constant 0 : index
    %61 = vector.load %arg5[%c2_64, %c2_65, %c0_66, %c0_67] : memref<3x3x4x8xbf16, #tpu.memory_space<vmem>>, vector<1x1x4x8xbf16>
    %62 = vector.shape_cast %61 : vector<1x1x4x8xbf16> to vector<4x8xbf16>
    %cst_68 = arith.constant dense<0.000000e+00> : vector<64x8xf32>
    %63 = tpu.matmul %60, %62, %cst_68 {dimension_numbers = #tpu.dot_dimension_numbers<[1], [0], [0], [1], [0, 0, 1, 1], [], []>} : vector<64x4xbf16>, vector<4x8xbf16>, vector<64x8xf32> -> vector<64x8xf32>
    %64 = arith.addf %57, %63 : vector<64x8xf32>
    %c0_69 = arith.constant 0 : index
    %c0_70 = arith.constant 0 : index
    %65 = vector.load %arg6[%c0_69, %c0_70] : memref<1x8xf32, #tpu.memory_space<vmem>>, vector<1x8xf32>
    %66 = vector.broadcast %65 : vector<1x8xf32> to vector<64x8xf32>
    %67 = arith.addf %64, %66 : vector<64x8xf32>
    %c0_71 = arith.constant 0 : index
    %c0_72 = arith.constant 0 : index
    %68 = vector.load %arg7[%c0_71, %c0_72] : memref<1x8xf32, #tpu.memory_space<vmem>>, vector<1x8xf32>
    %69 = vector.broadcast %68 : vector<1x8xf32> to vector<64x8xf32>
    %70 = arith.mulf %67, %69 : vector<64x8xf32>
    %c0_73 = arith.constant 0 : index
    %c0_74 = arith.constant 0 : index
    %71 = vector.load %arg8[%c0_73, %c0_74] : memref<1x8xf32, #tpu.memory_space<vmem>>, vector<1x8xf32>
    %72 = vector.broadcast %71 : vector<1x8xf32> to vector<64x8xf32>
    %73 = arith.addf %70, %72 : vector<64x8xf32>
    %cst_75 = arith.constant 0.000000e+00 : f32
    %74 = vector.broadcast %cst_75 : f32 to vector<64x8xf32>
    %75 = arith.cmpf oge, %73, %74 : vector<64x8xf32>
    %cst_76 = arith.constant 1.000000e-01 : f32
    %76 = vector.broadcast %cst_76 : f32 to vector<64x8xf32>
    %77 = arith.mulf %76, %73 : vector<64x8xf32>
    %78 = arith.select %75, %73, %77 : vector<64x8xi1>, vector<64x8xf32>
    %79 = arith.truncf %78 : vector<64x8xf32> to vector<64x8xbf16>
    %c0_77 = arith.constant 0 : index
    %c0_78 = arith.constant 0 : index
    %c0_79 = arith.constant 0 : index
    %80 = vector.load %arg9[%c0_77, %c0_78, %c0_79] : memref<1x64x8xbf16, #tpu.memory_space<vmem>>, vector<1x64x8xbf16>
    %81 = vector.shape_cast %80 : vector<1x64x8xbf16> to vector<64x8xbf16>
    %82 = vector.shape_cast %79 : vector<64x8xbf16> to vector<1x64x8xbf16>
    tpu.vector_store %arg9[%c0_77, %c0_78, %c0_79], %82 {strides = array<i32>} : memref<1x64x8xbf16, #tpu.memory_space<vmem>>, vector<1x64x8xbf16>,
    return
  }
  func.func @transform_0(%arg0: i32, %arg1: i32) -> (i32, i32, i32, i32) {
    %c0_i32 = arith.constant 0 : i32
    %c0_i32_0 = arith.constant 0 : i32
    %c0_i32_1 = arith.constant 0 : i32
    %c0_i32_2 = arith.constant 0 : i32
    return %arg0, %c0_i32, %c0_i32_0, %c0_i32_1 : i32, i32, i32, i32
  }
  func.func @transform_1(%arg0: i32, %arg1: i32) -> (i32, i32) {
    %c0_i32 = arith.constant 0 : i32
    %c0_i32_0 = arith.constant 0 : i32
    %c0_i32_1 = arith.constant 0 : i32
    return %c0_i32, %c0_i32_0 : i32, i32
  }
  func.func @transform_2(%arg0: i32, %arg1: i32) -> (i32, i32) {
    %c0_i32 = arith.constant 0 : i32
    %c0_i32_0 = arith.constant 0 : i32
    %c0_i32_1 = arith.constant 0 : i32
    return %c0_i32, %c0_i32_0 : i32, i32
  }
  func.func @transform_3(%arg0: i32, %arg1: i32) -> (i32, i32, i32, i32) {
    %c0_i32 = arith.constant 0 : i32
    %c0_i32_0 = arith.constant 0 : i32
    %c0_i32_1 = arith.constant 0 : i32
    %c0_i32_2 = arith.constant 0 : i32
    return %c0_i32, %c0_i32_0, %c0_i32_1, %arg1 : i32, i32, i32, i32
  }
  func.func @transform_4(%arg0: i32, %arg1: i32) -> (i32, i32) {
    %c0_i32 = arith.constant 0 : i32
    %c0_i32_0 = arith.constant 0 : i32
    return %c0_i32, %arg1 : i32, i32
  }
  func.func @transform_5(%arg0: i32, %arg1: i32) -> (i32, i32) {
    %c0_i32 = arith.constant 0 : i32
    %c0_i32_0 = arith.constant 0 : i32
    return %c0_i32, %arg1 : i32, i32
  }
  func.func @transform_6(%arg0: i32, %arg1: i32) -> (i32, i32) {
    %c0_i32 = arith.constant 0 : i32
    %c0_i32_0 = arith.constant 0 : i32
    return %c0_i32, %arg1 : i32, i32
  }
  func.func @transform_7(%arg0: i32, %arg1: i32) -> (i32, i32, i32) {
    %c0_i32 = arith.constant 0 : i32
    %c0_i32_0 = arith.constant 0 : i32
    return %arg0, %c0_i32, %arg1 : i32, i32, i32
  }
}

</mosaic_0001>

<bundles_post_ra>
// kernel: tpu_custom_call.1
= control target key start
LH: loop header
LB: loop body
LE: loop exit
PB: predicated region body
PF: predicated region fallthrough
CT: control target
= control target key end

     0   :  { %s2430_s24 = smov 0   ;;  %s2432_s25 = smov 0   ;;  %s2919_s0 = inlined_call_operand.vmem [shape: f32[2,16,16,4], index: 0, kind: input, shape index: {}]   ;;  %s2920_s1 = inlined_call_operand.vmem [shape: f32[1,4], index: 1, kind: input, shape index: {}]   ;;  %s2921_s2 = inlined_call_operand.vmem [shape: f32[1,4], index: 2, kind: input, shape index: {}]   ;;  %s2922_s3 = inlined_call_operand.vmem [shape: bf16[3,3,4,8], index: 3, kind: input, shape index: {}]   ;;  %s2923_s4 = inlined_call_operand.vmem [shape: f32[1,8], index: 4, kind: input, shape index: {}]   ;;  %s2924_s5 = inlined_call_operand.vmem [shape: f32[1,8], index: 5, kind: input, shape index: {}]   ;;  %s2925_s6 = inlined_call_operand.vmem [shape: f32[1,8], index: 6, kind: input, shape index: {}]   ;;  %s2926_s7 = inlined_call_operand.vmem [shape: bf16[2,64,8], index: 7, kind: output, shape index: {}]  }
   0x1   :  { %s2434_s26 = smov 0  }
   0x2 LB: > { %s29_s27 = sadd.s32 1, %s2383_s25  ;;  %p2055_p0 = scmp.ge.s32.totalorder %s2387_s26, 1  ;;  %s2387_s26 = sphi %s2434_s26, %s17_s26   ;;  %s2383_s25 = sphi %s2432_s25, %s2928_s25   ;;  %s2379_s24 = sphi %s2430_s24, %s2927_s24  }
   0x3   : > { %p31_p1 = scmp.ge.s32.totalorder %s29_s27, 2  ;;  %p284_p2 = scmp.lt.s32.totalorder %s2387_s26, 3 }
   0x5   : > { %s2930_s27 = smov (%p31_p1, %s29_s27), 0  ;;  %p285_p3 = pnand %p2055_p0, %p284_p2 }
   0x6   : > { %v2062_v0 = vld [vmem:[%s2922_s3 + $0x2] sm:$0x3] (!%p285_p3)  ;;  %vm843_vm0 = vcmask (!%p285_p3), 1041408   ;;  %v2454_v1 = vld [vmem:[%s2922_s3 + $0x8] sm:$0x3] (!%p285_p3)  ;;  %p332_p4 = scmp.lt.s32.totalorder (!%p285_p3), %s2379_s24, 1 }
   0x7   : > { %288 = sbr.rel (%p285_p3) target bundleno = 370 (0x172), region = 48  ;;  %2330 = vmatprep.subr.msk.bf16.mxu1 (!%p285_p3), %vm843_vm0, %v2062_v0  ;;  %2334 = vmatprep.subr.msk.bf16.mxu0 (!%p285_p3), %vm843_vm0, %v2454_v1  ;;  %v845_v2 = vsel (!%p285_p3), %vm843_vm0, %v2062_v0, 0  ;;  %v2462_v3 = vsel (!%p285_p3), %vm843_vm0, %v2454_v1, 0  ;;  %vm569_vm1 = vcmask (!%p285_p3), 31744   ;;  %vm572_vm2 = vcmask (!%p285_p3), 25600  }
   0x8   : > { %2175 = vmatpush3.bf16.msra.mxu1 (!%p285_p3), %v845_v2  ;;  %2215 = vmatpush3.bf16.msra.mxu0 (!%p285_p3), %v2462_v3  ;;  %v2389_v4 = vmov (!%p285_p3), 0.0   ;;  %v807_v5 = vld [vmem:[%s2922_s3] sm:$0x3] (!%p285_p3)  ;;  %v2086_v6 = vld [vmem:[%s2922_s3 + $0xa] sm:$0x3] (!%p285_p3)  ;;  %vm610_vm3 = vcmask (!%p285_p3), 1040384  }
   0x9   : > { %570 = vst.msk [vmem:[#allocation2] sm:$0xff] (!%p285_p3), %vm569_vm1, %v2389_v4  ;;  %571 = vst.msk [vmem:[#allocation2 + $0x8] sm:$0xff] (!%p285_p3), %vm569_vm1, %v2389_v4  ;;  %v2480_v7 = vld [vmem:[%s2920_s1] ss:$0 sm:$0xff] (!%p285_p3)  ;;  %2331 = vmatprep.subr.msk.bf16.mxu1 (!%p285_p3), %vm843_vm0, %v807_v5  ;;  %2336 = vmatprep.subr.msk.bf16.mxu0 (!%p285_p3), %vm843_vm0, %v2086_v6  ;;  %v2497_v9 = vld [vmem:[%s2922_s3 + $0xc] sm:$0x3] (!%p285_p3) }
   0xa   : > { %573 = vst.msk [vmem:[#allocation2 + $0x10] sm:$0x3] (!%p285_p3), %vm572_vm2, %v2389_v4  ;;  %v2492_v8 = vld [vmem:[%s2921_s2] ss:$0 sm:$0xff] (!%p285_p3)  ;;  %v2503_v13 = vsel (!%p285_p3), %vm843_vm0, %v807_v5, 0  ;;  %v2512_v20 = vsel (!%p285_p3), %vm843_vm0, %v2086_v6, 0 }
   0xb   : > { %v2521_v26 = vsel (!%p285_p3), %vm843_vm0, %v2497_v9, 0 }
   0xe   : > { %s2932_s24 = smov (!%p332_p4, %s2379_s24), 1 }
   0xf   : > { %s2119_s13 = sshll.u32 %s2932_s24, 8 }
  0x10   : > { %s2487_s18 = scalar_lea.vmem %s2919_s0, %s2119_s13 }
  0x11   : > { %v365_v10 = vld [vmem:[%s2487_s18 + $0x10] sm:$0xff]  ;;  %v366_v11 = vld [vmem:[%s2487_s18 + $0x18] sm:$0xff]  ;;  %v363_v12 = vld [vmem:[%s2487_s18] sm:$0xff] }
  0x12   : > { %v404_v14 = vmul.f32 %v2480_v7, %v365_v10  ;;  %v405_v15 = vmul.f32 %v2480_v7, %v366_v11  ;;  %v364_v16 = vld [vmem:[%s2487_s18 + $0x8] sm:$0xff]  ;;  %v367_v17 = vld [vmem:[%s2487_s18 + $0x20] sm:$0xff]  ;;  %v402_v19 = vmul.f32 %v2480_v7, %v363_v12  ;;  %v369_v24 = vld [vmem:[%s2487_s18 + $0x30] sm:$0xff] }
  0x13   : > { %v368_v18 = vld [vmem:[%s2487_s18 + $0x28] sm:$0xff]  ;;  %v403_v21 = vmul.f32 %v2480_v7, %v364_v16  ;;  %v406_v22 = vmul.f32 %v2480_v7, %v367_v17  ;;  %v370_v25 = vld [vmem:[%s2487_s18 + $0x38] sm:$0xff]  ;;  %v408_v30 = vmul.f32 %v2480_v7, %v369_v24  ;;  %v373_v37 = vld [vmem:[%s2487_s18 + $0x50] sm:$0xff] }
  0x14   : > { %v407_v23 = vmul.f32 %v2480_v7, %v368_v18  ;;  %v443_v27 = vadd.f32 %v2492_v8, %v404_v14  ;;  %v444_v28 = vadd.f32 %v2492_v8, %v405_v15  ;;  %v441_v29 = vadd.f32 %v2492_v8, %v402_v19  ;;  %v374_v38 = vld [vmem:[%s2487_s18 + $0x58] sm:$0xff]  ;;  %v371_v63 = vld [vmem:[%s2487_s18 + $0x40] sm:$0xff]  ;;  %v372_v6 = vld [vmem:[%s2487_s18 + $0x48] sm:$0xff] }
  0x15   : > { %v442_v31 = vadd.f32 %v2492_v8, %v403_v21  ;;  %v445_v32 = vadd.f32 %v2492_v8, %v406_v22  ;;  %v409_v34 = vmul.f32 %v2480_v7, %v370_v25  ;;  %v412_v49 = vmul.f32 %v2480_v7, %v373_v37  ;;  %v375_v10 = vld [vmem:[%s2487_s18 + $0x60] sm:$0xff]  ;;  %v376_v11 = vld [vmem:[%s2487_s18 + $0x68] sm:$0xff] }
  0x16   : > { %v446_v33 = vadd.f32 %v2492_v8, %v407_v23  ;;  %vm475_vm4 = vcmp.ge.f32.partialorder %v443_v27, 0.0  ;;  %vm476_vm5 = vcmp.ge.f32.partialorder %v444_v28, 0.0  ;;  %v507_v35 = vmul.f32 0.1, %v443_v27  ;;  %v809_v17 = vld [vmem:[#allocation2 + $0x1] ss:$2 sm:$0xff] }
  0x17   : > { %v508_v36 = vmul.f32 0.1, %v444_v28  ;;  %vm473_vm6 = vcmp.ge.f32.partialorder %v441_v29, 0.0  ;;  %vm474_vm7 = vcmp.ge.f32.partialorder %v442_v31, 0.0  ;;  %vm477_vm8 = vcmp.ge.f32.partialorder %v445_v32, 0.0 }
  0x18   : > { %vm478_vm9 = vcmp.ge.f32.partialorder %v446_v33, 0.0  ;;  %v539_v39 = vsel %vm475_vm4, %v443_v27, %v507_v35  ;;  %v505_v41 = vmul.f32 0.1, %v441_v29  ;;  %v506_v42 = vmul.f32 0.1, %v442_v31 }
  0x19   : > { %v2533_v40 = vsel %vm476_vm5, %v444_v28, %v508_v36  ;;  %v614_v43 = vrot.slane %v539_v39, 7  ;;  %v509_v45 = vmul.f32 0.1, %v445_v32  ;;  %v510_v46 = vmul.f32 0.1, %v446_v33 }
  0x1a   : > { %v615_v44 = vrot.slane %v2533_v40, 7  ;;  %v537_v47 = vsel %vm473_vm6, %v441_v29, %v505_v41  ;;  %v2536_v48 = vsel %vm474_vm7, %v442_v31, %v506_v42  ;;  %v413_v50 = vmul.f32 %v2480_v7, %v374_v38  ;;  %v377_v42 = vld [vmem:[%s2487_s18 + $0x70] sm:$0xff]  ;;  %v2787_v40 = vld [vmem:[%s2922_s3 + $0x6] sm:$0x3] }
  0x1b   : > { %v708_v52 = vsel %vm610_vm3, 0.0, %v614_v43  ;;  %v541_v53 = vsel %vm477_vm8, %v445_v32, %v509_v45  ;;  %v2546_v54 = vsel %vm478_vm9, %v446_v33, %v510_v46  ;;  %v611_v55 = vrot.slane %v537_v47, 7  ;;  %v381_v45 = vld [vmem:[%s2487_s18 + $0x90] sm:$0xff] }
  0x1c   : > { %v616_v51 = vsel %vm610_vm3, %v614_v43, %v615_v44  ;;  %743 = vst.msk [vmem:[#allocation2 + $0x30] sm:$0xff] %vm569_vm1, %v708_v52  ;;  %v612_v56 = vrot.slane %v2536_v48, 7  ;;  %v617_v57 = vrot.slane %v541_v53, 7  ;;  %v618_v58 = vrot.slane %v2546_v54, 7  ;;  %v378_v43 = vld [vmem:[%s2487_s18 + $0x78] sm:$0xff] }
  0x1d   : > { %744 = vst.msk [vmem:[#allocation2 + $0x38] sm:$0xff] %vm569_vm1, %v616_v51  ;;  %v447_v59 = vadd.f32 %v2492_v8, %v408_v30  ;;  %v448_v60 = vadd.f32 %v2492_v8, %v409_v34  ;;  %v451_v61 = vadd.f32 %v2492_v8, %v412_v49  ;;  %v452_v62 = vadd.f32 %v2492_v8, %v413_v50 }
  0x1e   : > { %v613_v0 = vsel %vm610_vm3, %v611_v55, %v612_v56  ;;  %v619_v2 = vsel %vm610_vm3, %v617_v57, %v618_v58  ;;  %v707_v4 = vsel %vm610_vm3, 0.0, %v611_v55  ;;  %v709_v5 = vsel %vm610_vm3, 0.0, %v617_v57  ;;  %v382_v55 = vld [vmem:[%s2487_s18 + $0x98] sm:$0xff] }
  0x1f   : > { %740 = vst.msk [vmem:[#allocation2 + $0x18] sm:$0xff] %vm569_vm1, %v707_v4  ;;  %741 = vst.msk [vmem:[#allocation2 + $0x20] sm:$0xff] %vm569_vm1, %v613_v0  ;;  %vm479_vm10 = vcmp.ge.f32.partialorder %v447_v59, 0.0  ;;  %vm480_vm11 = vcmp.ge.f32.partialorder %v448_v60, 0.0  ;;  %vm483_vm12 = vcmp.ge.f32.partialorder %v451_v61, 0.0  ;;  %vm484_vm13 = vcmp.ge.f32.partialorder %v452_v62, 0.0 }
  0x20   : > { %746 = vst.msk [vmem:[#allocation2 + $0x48] sm:$0xff] %vm569_vm1, %v709_v5  ;;  %747 = vst.msk [vmem:[#allocation2 + $0x50] sm:$0xff] %vm569_vm1, %v619_v2  ;;  %v511_v12 = vmul.f32 0.1, %v447_v59  ;;  %v512_v14 = vmul.f32 0.1, %v448_v60  ;;  %v410_v16 = vmul.f32 %v2480_v7, %v371_v63  ;;  %v411_v19 = vmul.f32 %v2480_v7, %v372_v6 }
  0x21   : > { %v515_v15 = vmul.f32 0.1, %v451_v61  ;;  %v516_v18 = vmul.f32 0.1, %v452_v62  ;;  %v414_v21 = vmul.f32 %v2480_v7, %v375_v10  ;;  %v415_v22 = vmul.f32 %v2480_v7, %v376_v11 }
  0x22   : > { %v543_v23 = vsel %vm479_vm10, %v447_v59, %v511_v12  ;;  %v544_v24 = vsel %vm480_vm11, %v448_v60, %v512_v14  ;;  %v449_v27 = vadd.f32 %v2492_v8, %v410_v16  ;;  %v450_v35 = vadd.f32 %v2492_v8, %v411_v19  ;;  %v385_v19 = vld [vmem:[%s2487_s18 + $0xb0] sm:$0xff] }
  0x23   : > { %v547_v25 = vsel %vm483_vm12, %v451_v61, %v515_v15  ;;  %v548_v29 = vsel %vm484_vm13, %v452_v62, %v516_v18  ;;  %v620_v30 = vrot.slane %v543_v23, 7  ;;  %v621_v31 = vrot.slane %v544_v24, 7 }
  0x24   : > { %v811_v28 = vld [vmem:[#allocation2 + $0x31] ss:$2 sm:$0xff]  ;;  %v626_v32 = vrot.slane %v547_v25, 7  ;;  %v627_v34 = vrot.slane %v548_v29, 7  ;;  %v453_v36 = vadd.f32 %v2492_v8, %v414_v21  ;;  %v454_v51 = vadd.f32 %v2492_v8, %v415_v22 }
  0x25   : > { %v824_v33 = vpack.c.bf16 %v811_v28, %v809_v17  ;;  %v622_v37 = vsel %vm610_vm3, %v620_v30, %v621_v31  ;;  %v710_v38 = vsel %vm610_vm3, 0.0, %v620_v30  ;;  %v726_v41 = vsel %vm610_vm3, %v621_v31, 0.0  ;;  %v386_v25 = vld [vmem:[%s2487_s18 + $0xb8] sm:$0xff] }
  0x26   : > { %v712_v39 = vsel %vm610_vm3, 0.0, %v626_v32  ;;  %v1213_v46 = vld [vmem:[#allocation2 + $0x19] ss:$2 sm:$0xff]  ;;  %v628_v49 = vsel %vm610_vm3, %v626_v32, %v627_v34  ;;  %v728_v50 = vsel %vm610_vm3, %v627_v34, 0.0  ;;  %749 = vst.msk [vmem:[#allocation2 + $0x60] sm:$0xff] %vm569_vm1, %v710_v38  ;;  %750 = vst.msk [vmem:[#allocation2 + $0x68] sm:$0xff] %vm569_vm1, %v622_v37  ;;  %v416_v60 = vmul.f32 %v2480_v7, %v377_v42 }
  0x27   : > { %2176 = vmatprep.mubr.msk.bf16.mxu1 %vm569_vm1, %v824_v33  ;;  %v1215_v47 = vld [vmem:[#allocation2 + $0x49] ss:$2 sm:$0xff]  ;;  %751 = vst.msk [vmem:[#allocation2 + $0x70] sm:$0x3] %vm572_vm2, %v726_v41  ;;  %vm481_vm14 = vcmp.ge.f32.partialorder %v449_v27, 0.0  ;;  %vm482_vm15 = vcmp.ge.f32.partialorder %v450_v35, 0.0  ;;  %v417_v63 = vmul.f32 %v2480_v7, %v378_v43  ;;  %v420_v0 = vmul.f32 %v2480_v7, %v381_v45 }
  0x28   : > { %755 = vst.msk [vmem:[#allocation2 + $0x90] sm:$0xff] %vm569_vm1, %v712_v39  ;;  %v1228_v52 = vpack.c.bf16 %v1215_v47, %v1213_v46  ;;  %756 = vst.msk [vmem:[#allocation2 + $0x98] sm:$0xff] %vm569_vm1, %v628_v49  ;;  %vm485_vm4 = vcmp.ge.f32.partialorder %v453_v36, 0.0  ;;  %v513_v53 = vmul.f32 0.1, %v449_v27  ;;  %vm486_vm5 = vcmp.ge.f32.partialorder %v454_v51, 0.0 }
  0x29   : > { %757 = vst.msk [vmem:[#allocation2 + $0xa0] sm:$0x3] %vm572_vm2, %v728_v50  ;;  %v514_v57 = vmul.f32 0.1, %v450_v35  ;;  %v517_v59 = vmul.f32 0.1, %v453_v36  ;;  %v421_v6 = vmul.f32 %v2480_v7, %v382_v55  ;;  %v455_v14 = vadd.f32 %v2492_v8, %v416_v60 }
  0x2a   : > { %2216 = vmatprep.mubr.msk.bf16.mxu0 %vm569_vm1, %v1228_v52  ;;  %v518_v61 = vmul.f32 0.1, %v454_v51  ;;  %v545_v62 = vsel %vm481_vm14, %v449_v27, %v513_v53  ;;  %v456_v17 = vadd.f32 %v2492_v8, %v417_v63  ;;  %v459_v18 = vadd.f32 %v2492_v8, %v420_v0  ;;  %v389_v27 = vld [vmem:[%s2487_s18 + $0xd0] sm:$0xff]  ;;  %v390_v34 = vld [vmem:[%s2487_s18 + $0xd8] sm:$0xff]  ;;  %v2634_v39 = vld [vmem:[%s2922_s3 + $0x4] sm:$0x3] }
  0x2b   : > { %v2601_v2 = vsel %vm482_vm15, %v450_v35, %v514_v57  ;;  %v549_v4 = vsel %vm485_vm4, %v453_v36, %v517_v59  ;;  %v623_v5 = vrot.slane %v545_v62, 7  ;;  %v460_v24 = vadd.f32 %v2492_v8, %v421_v6 }
  0x2c   : > { %v2604_v10 = vsel %vm486_vm5, %v454_v51, %v518_v61  ;;  %v624_v11 = vrot.slane %v2601_v2, 7  ;;  %v629_v12 = vrot.slane %v549_v4, 7  ;;  %vm487_vm6 = vcmp.ge.f32.partialorder %v455_v14, 0.0  ;;  %v388_v2 = vld [vmem:[%s2487_s18 + $0xc8] sm:$0xff] }
  0x2d   : > { %v630_v15 = vrot.slane %v2604_v10, 7  ;;  %v711_v16 = vsel %vm610_vm3, 0.0, %v623_v5  ;;  %v813_v21 = vld [vmem:[#allocation2 + $0x61] ss:$2 sm:$0xff]  ;;  %vm488_vm7 = vcmp.ge.f32.partialorder %v456_v17, 0.0  ;;  %vm491_vm8 = vcmp.ge.f32.partialorder %v459_v18, 0.0 }
  0x2e   : > { %v625_v22 = vsel %vm610_vm3, %v623_v5, %v624_v11  ;;  %v713_v23 = vsel %vm610_vm3, 0.0, %v629_v12  ;;  %752 = vst.msk [vmem:[#allocation2 + $0x78] sm:$0xff] %vm569_vm1, %v711_v16  ;;  %v519_v30 = vmul.f32 0.1, %v455_v14  ;;  %vm492_vm9 = vcmp.ge.f32.partialorder %v460_v24, 0.0 }
  0x2f   : > { %v815_v28 = vld [vmem:[#allocation2 + $0x91] ss:$2 sm:$0xff]  ;;  %v631_v29 = vsel %vm610_vm3, %v629_v12, %v630_v15  ;;  %753 = vst.msk [vmem:[#allocation2 + $0x80] sm:$0xff] %vm569_vm1, %v625_v22  ;;  %758 = vst.msk [vmem:[#allocation2 + $0xa8] sm:$0xff] %vm569_vm1, %v713_v23  ;;  %v520_v32 = vmul.f32 0.1, %v456_v17  ;;  %v424_v37 = vmul.f32 %v2480_v7, %v385_v19  ;;  %v425_v38 = vmul.f32 %v2480_v7, %v386_v25 }
  0x30   : > { %v825_v31 = vpack.c.bf16 %v815_v28, %v813_v21  ;;  %759 = vst.msk [vmem:[#allocation2 + $0xb0] sm:$0xff] %vm569_vm1, %v631_v29  ;;  %v523_v33 = vmul.f32 0.1, %v459_v18  ;;  %v524_v35 = vmul.f32 0.1, %v460_v24  ;;  %v551_v36 = vsel %vm487_vm6, %v455_v14, %v519_v30 }
  0x31   : > { %v2637_v41 = vsel %vm488_vm7, %v456_v17, %v520_v32  ;;  %v632_v43 = vrot.slane %v551_v36, 7  ;;  %v428_v45 = vmul.f32 %v2480_v7, %v389_v27  ;;  %v429_v50 = vmul.f32 %v2480_v7, %v390_v34  ;;  %v2664_v5 = vld [vmem:[#allocation2] ss:$2 sm:$0xff]  ;;  %v2675_v23 = vld [vmem:[#allocation2 + $0x30] ss:$2 sm:$0xff] }
  0x32   : > { %2177 = vmatmul.mubr.msk.bf16.vlgmr.msra.gmra.mrb[0].mxu1 %vm569_vm1, %v825_v31  ;;  %v555_v42 = vsel %vm491_vm8, %v459_v18, %v523_v33  ;;  %v2641_v46 = vsel %vm492_vm9, %v460_v24, %v524_v35  ;;  %v633_v47 = vrot.slane %v2637_v41, 7  ;;  %v463_v53 = vadd.f32 %v2492_v8, %v424_v37  ;;  %v379_v17 = vld [vmem:[%s2487_s18 + $0x80] sm:$0xff]  ;;  %v380_v24 = vld [vmem:[%s2487_s18 + $0x88] sm:$0xff] }
  0x33   : > { %2185 = vmatpush3.bf16.msra.mxu1 %v2503_v13  ;;  %v638_v49 = vrot.slane %v555_v42, 7  ;;  %v639_v51 = vrot.slane %v2641_v46, 7  ;;  %v714_v52 = vsel %vm610_vm3, 0.0, %v632_v43  ;;  %v464_v55 = vadd.f32 %v2492_v8, %v425_v38  ;;  %v387_v32 = vld [vmem:[%s2487_s18 + $0xc0] sm:$0xff] }
  0x34   : > { %2332 = vmatprep.subr.msk.bf16.mxu1 %vm843_vm0, %v2634_v39  ;;  %v634_v13 = vsel %vm610_vm3, %v632_v43, %v633_v47  ;;  %761 = vst.msk [vmem:[#allocation2 + $0xc0] sm:$0xff] %vm569_vm1, %v714_v52  ;;  %v467_v59 = vadd.f32 %v2492_v8, %v428_v45  ;;  %v468_v60 = vadd.f32 %v2492_v8, %v429_v50  ;;  %vm495_vm10 = vcmp.ge.f32.partialorder %v463_v53, 0.0  ;;  %v391_v33 = vld [vmem:[%s2487_s18 + $0xe0] sm:$0xff]  ;;  %v392_v45 = vld [vmem:[%s2487_s18 + $0xe8] sm:$0xff] }
  0x35   : > { %v716_v57 = vsel %vm610_vm3, 0.0, %v638_v49  ;;  %v640_v62 = vsel %vm610_vm3, %v638_v49, %v639_v51  ;;  %762 = vst.msk [vmem:[#allocation2 + $0xc8] sm:$0xff] %vm569_vm1, %v634_v13  ;;  %vm496_vm11 = vcmp.ge.f32.partialorder %v464_v55, 0.0  ;;  %v527_v63 = vmul.f32 0.1, %v463_v53 }
  0x36   : > { %v1217_v61 = vld [vmem:[#allocation2 + $0x79] ss:$2 sm:$0xff]  ;;  %767 = vst.msk [vmem:[#allocation2 + $0xf0] sm:$0xff] %vm569_vm1, %v716_v57  ;;  %768 = vst.msk [vmem:[#allocation2 + $0xf8] sm:$0xff] %vm569_vm1, %v640_v62  ;;  %vm499_vm12 = vcmp.ge.f32.partialorder %v467_v59, 0.0  ;;  %vm500_vm13 = vcmp.ge.f32.partialorder %v468_v60, 0.0  ;;  %v418_v10 = vmul.f32 %v2480_v7, %v379_v17  ;;  %v426_v49 = vmul.f32 %v2480_v7, %v387_v32 }
  0x37   : > { %v1219_v0 = vld [vmem:[#allocation2 + $0xa9] ss:$2 sm:$0xff]  ;;  %v528_v4 = vmul.f32 0.1, %v464_v55  ;;  %v531_v12 = vmul.f32 0.1, %v467_v59  ;;  %v559_v16 = vsel %vm495_vm10, %v463_v53, %v527_v63  ;;  %v427_v50 = vmul.f32 %v2480_v7, %v388_v2 }
  0x38   : > { %v1229_v6 = vpack.c.bf16 %v1219_v0, %v1217_v61  ;;  %v532_v14 = vmul.f32 0.1, %v468_v60  ;;  %v644_v19 = vrot.slane %v559_v16, 7  ;;  %v723_v21 = vsel %vm610_vm3, %v612_v56, 0.0  ;;  %v383_v56 = vld [vmem:[%s2487_s18 + $0xa0] sm:$0xff] }
  0x39   : > { %v2667_v18 = vsel %vm496_vm11, %v464_v55, %v528_v4  ;;  %v725_v22 = vsel %vm610_vm3, %v618_v58, 0.0  ;;  %v563_v25 = vsel %vm499_vm12, %v467_v59, %v531_v12  ;;  %742 = vst.msk [vmem:[#allocation2 + $0x28] sm:$0x3] %vm572_vm2, %v723_v21  ;;  %v727_v54 = vsel %vm610_vm3, %v624_v11, 0.0  ;;  %v384_v58 = vld [vmem:[%s2487_s18 + $0xa8] sm:$0xff] }
  0x3a   : > { %2217 = vmatmul.mubr.msk.bf16.vlgmr.msra.gmra.mrb[0].mxu0 %vm569_vm1, %v1229_v6  ;;  %v2681_v27 = vsel %vm500_vm13, %v468_v60, %v532_v14  ;;  %v645_v48 = vrot.slane %v2667_v18, 7  ;;  %748 = vst.msk [vmem:[#allocation2 + $0x58] sm:$0x3] %vm572_vm2, %v725_v22  ;;  %v650_v28 = vrot.slane %v563_v25, 7  ;;  %v718_v30 = vsel %vm610_vm3, 0.0, %v644_v19 }
  0x3b   : > { %2225 = vmatpush3.bf16.msra.mxu0 %v2512_v20  ;;  %v651_v29 = vrot.slane %v2681_v27, 7  ;;  %v729_v31 = vsel %vm610_vm3, %v630_v15, 0.0  ;;  %754 = vst.msk [vmem:[#allocation2 + $0x88] sm:$0x3] %vm572_vm2, %v727_v54  ;;  %v803_v20 = vpack.c.bf16 %v2675_v23, %v2664_v5  ;;  %v419_v15 = vmul.f32 %v2480_v7, %v380_v24  ;;  %v393_v5 = vld [vmem:[%s2487_s18 + $0xf0] sm:$0xff] }
  0x3c   : > { %v646_v11 = vsel %vm610_vm3, %v644_v19, %v645_v48  ;;  %773 = vst.msk [vmem:[#allocation2 + $0x120] sm:$0xff] %vm569_vm1, %v718_v30  ;;  %2337 = vmatprep.subr.msk.bf16.mxu0 %vm843_vm0, %v2497_v9  ;;  %v817_v34 = vld [vmem:[#allocation2 + $0xc1] ss:$2 sm:$0xff]  ;;  %v720_v36 = vsel %vm610_vm3, 0.0, %v650_v28  ;;  %v422_v9 = vmul.f32 %v2480_v7, %v383_v56  ;;  %v423_v37 = vmul.f32 %v2480_v7, %v384_v58  ;;  %v1433_v18 = vld [vmem:[#allocation2 + $0x30] ss:$2 sm:$0xff] }
  0x3d   : > { %760 = vst.msk [vmem:[#allocation2 + $0xb8] sm:$0x3] %vm572_vm2, %v729_v31  ;;  %v652_v35 = vsel %vm610_vm3, %v650_v28, %v651_v29  ;;  %v819_v38 = vld [vmem:[#allocation2 + $0xf1] ss:$2 sm:$0xff]  ;;  %v457_v42 = vadd.f32 %v2492_v8, %v418_v10  ;;  %v458_v43 = vadd.f32 %v2492_v8, %v419_v15  ;;  %v430_v13 = vmul.f32 %v2480_v7, %v391_v33  ;;  %v2741_v28 = vld [vmem:[%s2922_s3 + $0xe] sm:$0x3] }
  0x3e   : > { %774 = vst.msk [vmem:[#allocation2 + $0x128] sm:$0xff] %vm569_vm1, %v646_v11  ;;  %779 = vst.msk [vmem:[#allocation2 + $0x150] sm:$0xff] %vm569_vm1, %v720_v36  ;;  %v826_v52 = vpack.c.bf16 %v819_v38, %v817_v34  ;;  %v461_v53 = vadd.f32 %v2492_v8, %v422_v9  ;;  %v462_v55 = vadd.f32 %v2492_v8, %v423_v37  ;;  %v792_v34 = vld [vmem:[#allocation2 + $0x60] ss:$2 sm:$0xff]  ;;  %v794_v38 = vld [vmem:[#allocation2 + $0x90] ss:$2 sm:$0xff] }
  0x3f   : > { %780 = vst.msk [vmem:[#allocation2 + $0x158] sm:$0xff] %vm569_vm1, %v652_v35  ;;  %vm489_vm14 = vcmp.ge.f32.partialorder %v457_v42, 0.0  ;;  %vm490_vm15 = vcmp.ge.f32.partialorder %v458_v43, 0.0  ;;  %v521_v57 = vmul.f32 0.1, %v457_v42  ;;  %v431_v62 = vmul.f32 %v2480_v7, %v392_v45 }
  0x40   : > { %v522_v59 = vmul.f32 0.1, %v458_v43  ;;  %2180 = vmatprep.mubr.msk.bf16.mxu1 %vm569_vm1, %v826_v52  ;;  %v1323_v60 = vld [vmem:[#allocation2 + $0x1a] ss:$2 sm:$0xff]  ;;  %vm493_vm4 = vcmp.ge.f32.partialorder %v461_v53, 0.0  ;;  %vm494_vm5 = vcmp.ge.f32.partialorder %v462_v55, 0.0  ;;  %v465_v63 = vadd.f32 %v2492_v8, %v426_v49 }
  0x41   : > { %v1325_v61 = vld [vmem:[#allocation2 + $0x4a] ss:$2 sm:$0xff]  ;;  %v525_v6 = vmul.f32 0.1, %v461_v53  ;;  %v526_v12 = vmul.f32 0.1, %v462_v55  ;;  %v553_v14 = vsel %vm489_vm14, %v457_v42, %v521_v57  ;;  %v466_v21 = vadd.f32 %v2492_v8, %v427_v50 }
  0x42   : > { %v1338_v0 = vpack.c.bf16 %v1325_v61, %v1323_v60  ;;  %v1327_v4 = vld [vmem:[#allocation2 + $0x7a] ss:$2 sm:$0xff]  ;;  %v554_v17 = vsel %vm490_vm15, %v458_v43, %v522_v59  ;;  %v635_v19 = vrot.slane %v553_v14, 7  ;;  %v469_v22 = vadd.f32 %v2492_v8, %v430_v13 }
  0x43   : > { %v557_v54 = vsel %vm493_vm4, %v461_v53, %v525_v6  ;;  %v558_v56 = vsel %vm494_vm5, %v462_v55, %v526_v12  ;;  %v636_v58 = vrot.slane %v554_v17, 7  ;;  %v470_v11 = vadd.f32 %v2492_v8, %v431_v62  ;;  %v796_v52 = vld [vmem:[#allocation2 + $0xc0] ss:$2 sm:$0xff]  ;;  %v798_v53 = vld [vmem:[#allocation2 + $0xf0] ss:$2 sm:$0xff] }
  0x44   : > { %v1329_v16 = vld [vmem:[#allocation2 + $0xaa] ss:$2 sm:$0xff]  ;;  %2226 = vmatprep.mubr.msk.bf16.mxu0 %vm569_vm1, %v1338_v0  ;;  %v641_v31 = vrot.slane %v557_v54, 7  ;;  %v642_v32 = vrot.slane %v558_v56, 7  ;;  %v715_v2 = vsel %vm610_vm3, 0.0, %v635_v19  ;;  %vm497_vm6 = vcmp.ge.f32.partialorder %v465_v63, 0.0 }
  0x45   : > { %v821_v24 = vld [vmem:[#allocation2 + $0x121] ss:$2 sm:$0xff]  ;;  %v1339_v25 = vpack.c.bf16 %v1329_v16, %v1327_v4  ;;  %v637_v15 = vsel %vm610_vm3, %v635_v19, %v636_v58  ;;  %v731_v33 = vsel %vm610_vm3, %v636_v58, 0.0  ;;  %764 = vst.msk [vmem:[#allocation2 + $0xd8] sm:$0xff] %vm569_vm1, %v715_v2  ;;  %vm498_vm7 = vcmp.ge.f32.partialorder %v466_v21, 0.0  ;;  %v394_v62 = vld [vmem:[%s2487_s18 + $0xf8] sm:$0xff] }
  0x46   : > { %v823_v30 = vld [vmem:[#allocation2 + $0x151] ss:$2 sm:$0xff]  ;;  %v643_v35 = vsel %vm610_vm3, %v641_v31, %v642_v32  ;;  %v717_v36 = vsel %vm610_vm3, 0.0, %v641_v31  ;;  %v733_v9 = vsel %vm610_vm3, %v642_v32, 0.0  ;;  %765 = vst.msk [vmem:[#allocation2 + $0xe0] sm:$0xff] %vm569_vm1, %v637_v15  ;;  %vm501_vm8 = vcmp.ge.f32.partialorder %v469_v22, 0.0 }
  0x47   : > { %v827_v10 = vpack.c.bf16 %v823_v30, %v821_v24  ;;  %2227 = vmatmul.mubr.msk.bf16.vlgmr.msra.gmra.mrb[0].mxu0 %vm569_vm1, %v1339_v25  ;;  %766 = vst.msk [vmem:[#allocation2 + $0xe8] sm:$0x3] %vm572_vm2, %v731_v33  ;;  %772 = vst.msk [vmem:[#allocation2 + $0x118] sm:$0x3] %vm572_vm2, %v733_v9  ;;  %vm502_vm9 = vcmp.ge.f32.partialorder %v470_v11, 0.0  ;;  %v1027_v45 = vsel %vm843_vm0, %v2634_v39, 0  ;;  %v804_v23 = vpack.c.bf16 %v794_v38, %v792_v34 }
  0x48   : > { %2235 = vmatpush3.bf16.msra.mxu0 %v2521_v26  ;;  %770 = vst.msk [vmem:[#allocation2 + $0x108] sm:$0xff] %vm569_vm1, %v717_v36  ;;  %771 = vst.msk [vmem:[#allocation2 + $0x110] sm:$0xff] %vm569_vm1, %v643_v35  ;;  %v529_v26 = vmul.f32 0.1, %v465_v63  ;;  %v530_v37 = vmul.f32 0.1, %v466_v21  ;;  %v805_v4 = vpack.c.bf16 %v798_v53, %v796_v52  ;;  %v433_v19 = vmul.f32 %v2480_v7, %v394_v62 }
  0x49   : > { %2181 = vmatmul.mubr.msk.bf16.gmra.mrb[4].mxu1 %vm569_vm1, %v827_v10  ;;  %2338 = vmatprep.subr.msk.bf16.mxu0 %vm843_vm0, %v2741_v28  ;;  %v533_v42 = vmul.f32 0.1, %v469_v22  ;;  %v534_v43 = vmul.f32 0.1, %v470_v11  ;;  %v724_v61 = vsel %vm610_vm3, %v615_v44, 0.0  ;;  %v432_v44 = vmul.f32 %v2480_v7, %v393_v5  ;;  %s2120_s18 = sshll.u32 %s2932_s24, 5 }
  0x4a   : > { %2186 = vmatprep.mubr.msk.bf16.mxu1 %vm569_vm1, %v803_v20  ;;  %v561_v49 = vsel %vm497_vm6, %v465_v63, %v529_v26  ;;  %v562_v50 = vsel %vm498_vm7, %v466_v21, %v530_v37  ;;  %745 = vst.msk [vmem:[#allocation2 + $0x40] sm:$0x3] %vm572_vm2, %v724_v61  ;;  %v730_v21 = vsel %vm610_vm3, %v633_v47, 0.0  ;;  %v734_v24 = vsel %vm610_vm3, %v645_v48, 0.0  ;;  %v800_v41 = vld [vmem:[#allocation2 + $0x120] ss:$2 sm:$0xff]  ;;  %s2884_s20 = scalar_lea.vmem %s2926_s7, %s2120_s18 }
  0x4b   : > { %v565_v55 = vsel %vm501_vm8, %v469_v22, %v533_v42  ;;  %v566_v13 = vsel %vm502_vm9, %v470_v11, %v534_v43  ;;  %v647_v57 = vrot.slane %v561_v49, 7  ;;  %v648_v59 = vrot.slane %v562_v50, 7  ;;  %763 = vst.msk [vmem:[#allocation2 + $0xd0] sm:$0x3] %vm572_vm2, %v730_v21  ;;  %775 = vst.msk [vmem:[#allocation2 + $0x130] sm:$0x3] %vm572_vm2, %v734_v24 }
  0x4c   : > { %v653_v20 = vrot.slane %v565_v55, 7  ;;  %v654_v60 = vrot.slane %v566_v13, 7  ;;  %v732_v22 = vsel %vm610_vm3, %v639_v51, 0.0  ;;  %v471_v54 = vadd.f32 %v2492_v8, %v432_v44  ;;  %v802_v46 = vld [vmem:[#allocation2 + $0x150] ss:$2 sm:$0xff] }
  0x4d   : > { %v649_v39 = vsel %vm610_vm3, %v647_v57, %v648_v59  ;;  %v719_v63 = vsel %vm610_vm3, 0.0, %v647_v57  ;;  %v735_v0 = vsel %vm610_vm3, %v648_v59, 0.0  ;;  %769 = vst.msk [vmem:[#allocation2 + $0x100] sm:$0x3] %vm572_vm2, %v732_v22  ;;  %v736_v7 = vsel %vm610_vm3, %v651_v29, 0.0 }
  0x4e   : > { %v1331_v6 = vld [vmem:[#allocation2 + $0xda] ss:$2 sm:$0xff]  ;;  %v655_v12 = vsel %vm610_vm3, %v653_v20, %v654_v60  ;;  %v721_v14 = vsel %vm610_vm3, 0.0, %v653_v20  ;;  %v737_v16 = vsel %vm610_vm3, %v654_v60, 0.0  ;;  %776 = vst.msk [vmem:[#allocation2 + $0x138] sm:$0xff] %vm569_vm1, %v719_v63  ;;  %777 = vst.msk [vmem:[#allocation2 + $0x140] sm:$0xff] %vm569_vm1, %v649_v39  ;;  %v472_v51 = vadd.f32 %v2492_v8, %v433_v19 }
  0x4f   : > { %778 = vst.msk [vmem:[#allocation2 + $0x148] sm:$0x3] %vm572_vm2, %v735_v0  ;;  %v1333_v17 = vld [vmem:[#allocation2 + $0x10a] ss:$2 sm:$0xff]  ;;  %784 = vst.msk [vmem:[#allocation2 + $0x178] sm:$0x3] %vm572_vm2, %v737_v16  ;;  %v806_v56 = vpack.c.bf16 %v802_v46, %v800_v41 }
  0x50   : > { %782 = vst.msk [vmem:[#allocation2 + $0x168] sm:$0xff] %vm569_vm1, %v721_v14  ;;  %783 = vst.msk [vmem:[#allocation2 + $0x170] sm:$0xff] %vm569_vm1, %v655_v12  ;;  %v1340_v25 = vpack.c.bf16 %v1333_v17, %v1331_v6  ;;  %v993_v47 = vld [vmem:[#allocation2 + $0x2] ss:$2 sm:$0xff]  ;;  %vm503_vm10 = vcmp.ge.f32.partialorder %v471_v54, 0.0  ;;  %vm504_vm11 = vcmp.ge.f32.partialorder %v472_v51, 0.0 }
  0x51   : > { %2187 = vmatmul.mubr.msk.bf16.vlgmr.msra.gmra.mrb[0].mxu1 %vm569_vm1, %v804_v23  ;;  %781 = vst.msk [vmem:[#allocation2 + $0x160] sm:$0x3] %vm572_vm2, %v736_v7  ;;  %v535_v27 = vmul.f32 0.1, %v471_v54  ;;  %v1435_v48 = vld [vmem:[#allocation2 + $0x60] ss:$2 sm:$0xff] }
  0x52   : > { %2195 = vmatpush3.bf16.msra.mxu1 %v1027_v45  ;;  %2190 = vmatprep.mubr.msk.bf16.mxu1 %vm569_vm1, %v805_v4  ;;  %v536_v29 = vmul.f32 0.1, %v472_v51  ;;  %v995_v58 = vld [vmem:[#allocation2 + $0x32] ss:$2 sm:$0xff]  ;;  %v1448_v10 = vpack.c.bf16 %v1435_v48, %v1433_v18  ;;  %v997_v36 = vld [vmem:[#allocation2 + $0x62] ss:$2 sm:$0xff] }
  0x53   : > { %2230 = vmatprep.mubr.msk.bf16.mxu0 %vm569_vm1, %v1340_v25  ;;  %2333 = vmatprep.subr.msk.bf16.mxu1 %vm843_vm0, %v2787_v40  ;;  %v567_v30 = vsel %vm503_vm10, %v471_v54, %v535_v27  ;;  %v1008_v32 = vpack.c.bf16 %v995_v58, %v993_v47  ;;  %v999_v9 = vld [vmem:[#allocation2 + $0x92] ss:$2 sm:$0xff]  ;;  %v1001_v49 = vld [vmem:[#allocation2 + $0xc2] ss:$2 sm:$0xff]  ;;  %v1137_v53 = vsel %vm843_vm0, %v2787_v40, 0  ;;  %v1577_v13 = vsel %vm843_vm0, %v2741_v28, 0 }
  0x54   : > { %v568_v2 = vsel %vm504_vm11, %v472_v51, %v536_v29  ;;  %v656_v8 = vrot.slane %v567_v30, 7  ;;  %v1437_v26 = vld [vmem:[#allocation2 + $0x90] ss:$2 sm:$0xff]  ;;  %v1439_v37 = vld [vmem:[#allocation2 + $0xc0] ss:$2 sm:$0xff]  ;;  %v1009_v45 = vpack.c.bf16 %v999_v9, %v997_v36 }
  0x55   : > { %v657_v15 = vrot.slane %v568_v2, 7  ;;  %v1441_v42 = vld [vmem:[#allocation2 + $0xf0] ss:$2 sm:$0xff]  ;;  %v1443_v43 = vld [vmem:[#allocation2 + $0x120] ss:$2 sm:$0xff]  ;;  %v1449_v52 = vpack.c.bf16 %v1439_v37, %v1437_v26 }
  0x56   : > { %v1335_v31 = vld [vmem:[#allocation2 + $0x13a] ss:$2 sm:$0xff]  ;;  %v722_v34 = vsel %vm610_vm3, 0.0, %v656_v8  ;;  %v1450_v55 = vpack.c.bf16 %v1443_v43, %v1441_v42  ;;  %v2101_v59 = vld [vmem:[%s2922_s3 + $0x10] sm:$0x3] }
  0x57   : > { %v1337_v11 = vld [vmem:[#allocation2 + $0x16a] ss:$2 sm:$0xff]  ;;  %v658_v35 = vsel %vm610_vm3, %v656_v8, %v657_v15  ;;  %785 = vst.msk [vmem:[#allocation2 + $0x180] sm:$0xff] %vm569_vm1, %v722_v34  ;;  %v738_v38 = vsel %vm610_vm3, %v657_v15, 0.0  ;;  %v1543_v28 = vld [vmem:[#allocation2 + $0x31] ss:$2 sm:$0xff] }
  0x58   : > { %v1341_v33 = vpack.c.bf16 %v1337_v11, %v1335_v31  ;;  %786 = vst.msk [vmem:[#allocation2 + $0x188] sm:$0xff] %vm569_vm1, %v658_v35  ;;  %v1003_v50 = vld [vmem:[#allocation2 + $0xf2] ss:$2 sm:$0xff]  ;;  %v1005_v5 = vld [vmem:[#allocation2 + $0x122] ss:$2 sm:$0xff]  ;;  %v1687_v25 = vsel %vm843_vm0, %v2101_v59, 0 }
  0x59   : > { %2191 = vmatmul.mubr.msk.bf16.gmra.mrb[4].mxu1 %vm569_vm1, %v806_v56  ;;  %787 = vst.msk [vmem:[#allocation2 + $0x190] sm:$0x3] %vm572_vm2, %v738_v38  ;;  %v1010_v57 = vpack.c.bf16 %v1003_v50, %v1001_v49  ;;  %v1007_v23 = vld [vmem:[#allocation2 + $0x152] ss:$2 sm:$0xff]  ;;  %v1545_v39 = vld [vmem:[#allocation2 + $0x61] ss:$2 sm:$0xff] }
  0x5a   : > { %2231 = vmatmul.mubr.msk.bf16.gmra.mrb[4].mxu0 %vm569_vm1, %v1341_v33  ;;  %2196 = vmatprep.mubr.msk.bf16.mxu1 %vm569_vm1, %v1008_v32  ;;  %v1103_v20 = vld [vmem:[#allocation2 + $0x18] ss:$2 sm:$0xff]  ;;  %v1105_v62 = vld [vmem:[#allocation2 + $0x48] ss:$2 sm:$0xff]  ;;  %v1011_v63 = vpack.c.bf16 %v1007_v23, %v1005_v5  ;;  %v1558_v6 = vpack.c.bf16 %v1545_v39, %v1543_v28  ;;  %v1547_v16 = vld [vmem:[#allocation2 + $0x91] ss:$2 sm:$0xff] }
  0x5b   : > { %2236 = vmatprep.mubr.msk.bf16.mxu0 %vm569_vm1, %v1448_v10  ;;  %v1445_v60 = vld [vmem:[#allocation2 + $0x150] ss:$2 sm:$0xff]  ;;  %v1118_v4 = vpack.c.bf16 %v1105_v62, %v1103_v20  ;;  %v1549_v40 = vld [vmem:[#allocation2 + $0xc1] ss:$2 sm:$0xff]  ;;  %v1551_v44 = vld [vmem:[#allocation2 + $0xf1] ss:$2 sm:$0xff] }
  0x5c   : > { %v1107_v12 = vld [vmem:[#allocation2 + $0x78] ss:$2 sm:$0xff]  ;;  %v1109_v14 = vld [vmem:[#allocation2 + $0xa8] ss:$2 sm:$0xff]  ;;  %v1553_v17 = vld [vmem:[#allocation2 + $0x121] ss:$2 sm:$0xff]  ;;  %v1559_v22 = vpack.c.bf16 %v1549_v40, %v1547_v16 }
  0x5d   : > { %v1119_v19 = vpack.c.bf16 %v1109_v14, %v1107_v12  ;;  %v1111_v21 = vld [vmem:[#allocation2 + $0xd8] ss:$2 sm:$0xff]  ;;  %v1560_v24 = vpack.c.bf16 %v1553_v17, %v1551_v44  ;;  %v1555_v7 = vld [vmem:[#allocation2 + $0x151] ss:$2 sm:$0xff]  ;;  %v1117_v46 = vld [vmem:[#allocation2 + $0x168] ss:$2 sm:$0xff] }
  0x5e   : > { %v1115_v41 = vld [vmem:[#allocation2 + $0x138] ss:$2 sm:$0xff]  ;;  %v1221_v51 = vld [vmem:[#allocation2 + $0xd9] ss:$2 sm:$0xff]  ;;  %v1223_v18 = vld [vmem:[#allocation2 + $0x109] ss:$2 sm:$0xff] }
  0x5f   : > { %v1447_v61 = vld [vmem:[#allocation2 + $0x180] ss:$2 sm:$0xff]  ;;  %v1557_v47 = vld [vmem:[#allocation2 + $0x181] ss:$2 sm:$0xff]  ;;  %v1121_v29 = vpack.c.bf16 %v1117_v46, %v1115_v41  ;;  %v1230_v58 = vpack.c.bf16 %v1223_v18, %v1221_v51 }
  0x60   : > { %v1451_v0 = vpack.c.bf16 %v1447_v61, %v1445_v60  ;;  %v1653_v27 = vld [vmem:[#allocation2 + $0x32] ss:$2 sm:$0xff]  ;;  %v1655_v48 = vld [vmem:[#allocation2 + $0x62] ss:$2 sm:$0xff]  ;;  %v1561_v56 = vpack.c.bf16 %v1557_v47, %v1555_v7  ;;  %v1225_v11 = vld [vmem:[#allocation2 + $0x139] ss:$2 sm:$0xff] }
  0x61   : > { %2197 = vmatmul.mubr.msk.bf16.vlgmr.msra.gmra.mrb[0].mxu1 %vm569_vm1, %v1009_v45  ;;  %v1668_v30 = vpack.c.bf16 %v1655_v48, %v1653_v27  ;;  %v1659_v31 = vld [vmem:[#allocation2 + $0xc2] ss:$2 sm:$0xff]  ;;  %v1661_v32 = vld [vmem:[#allocation2 + $0xf2] ss:$2 sm:$0xff]  ;;  %v1227_v10 = vld [vmem:[#allocation2 + $0x169] ss:$2 sm:$0xff] }
  0x62   : > { %2237 = vmatmul.mubr.msk.bf16.vlgmr.msra.gmra.mrb[0].mxu0 %vm569_vm1, %v1449_v52  ;;  %2205 = vmatpush3.bf16.msra.mxu1 %v1137_v53  ;;  %v1663_v2 = vld [vmem:[#allocation2 + $0x122] ss:$2 sm:$0xff]  ;;  %v1231_v33 = vpack.c.bf16 %v1227_v10, %v1225_v11  ;;  %v1665_v34 = vld [vmem:[#allocation2 + $0x152] ss:$2 sm:$0xff] }
  0x63   : > { %2245 = vmatpush3.bf16.msra.mxu0 %v1577_v13  ;;  %2240 = vmatprep.mubr.msk.bf16.mxu0 %vm569_vm1, %v1450_v55  ;;  %v1670_v15 = vpack.c.bf16 %v1663_v2, %v1661_v32  ;;  %v1667_v35 = vld [vmem:[#allocation2 + $0x182] ss:$2 sm:$0xff]  ;;  %v2106_v43 = vld [vmem:[%s2923_s4] ss:$0 sm:$0xff] }
  0x64   : > { %2200 = vmatprep.mubr.msk.bf16.mxu1 %vm569_vm1, %v1010_v57  ;;  %2339 = vmatprep.subr.msk.bf16.mxu0 %vm843_vm0, %v2101_v59  ;;  %v1671_v36 = vpack.c.bf16 %v1667_v35, %v1665_v34  ;;  %v2865_v50 = vld [vmem:[%s2924_s5] ss:$0 sm:$0xff] }
  0x65   : > { %2335 = vmatprep.subr.msk.bf16.mxu1 %vm843_vm0, %v2454_v1  ;;  %v1113_v1 = vld [vmem:[#allocation2 + $0x108] ss:$2 sm:$0xff]  ;;  %v2870_v5 = vld [vmem:[%s2925_s6] ss:$0 sm:$0xff]  ;;  %vm1863_vm0 = vcmask 60416  }
  0x66   : > { %v1120_v54 = vpack.c.bf16 %v1113_v1, %v1111_v21 }
  0x69   : > { %2201 = vmatmul.mubr.msk.bf16.gmra.mrb[4].mxu1 %vm569_vm1, %v1011_v63 }
  0x6a   : > { %2241 = vmatmul.mubr.msk.bf16.gmra.mrb[4].mxu0 %vm569_vm1, %v1451_v0  ;;  %2206 = vmatprep.mubr.msk.bf16.mxu1 %vm569_vm1, %v1118_v4 }
  0x6b   : > { %2246 = vmatprep.mubr.msk.bf16.mxu0 %vm569_vm1, %v1558_v6 }
  0x71   : > { %2207 = vmatmul.mubr.msk.bf16.vlgmr.msra.gmra.mrb[0].mxu1 %vm569_vm1, %v1119_v19 }
  0x72   : > { %2247 = vmatmul.mubr.msk.bf16.vlgmr.msra.gmra.mrb[0].mxu0 %vm569_vm1, %v1559_v22  ;;  %2265 = vmatpush3.bf16.msra.mxu1 %v2462_v3  ;;  %v1657_v3 = vld [vmem:[#allocation2 + $0x92] ss:$2 sm:$0xff] }
  0x73   : > { %2255 = vmatpush3.bf16.msra.mxu0 %v1687_v25  ;;  %2250 = vmatprep.mubr.msk.bf16.mxu0 %vm569_vm1, %v1560_v24  ;;  %v1669_v8 = vpack.c.bf16 %v1659_v31, %v1657_v3 }
  0x74   : > { %2210 = vmatprep.mubr.msk.bf16.mxu1 %vm569_vm1, %v1120_v54 }
  0x79   : > { %2211 = vmatmul.mubr.msk.bf16.gmra.mrb[4].mxu1 %vm569_vm1, %v1121_v29 }
  0x7a   : > { %2251 = vmatmul.mubr.msk.bf16.gmra.mrb[4].mxu0 %vm569_vm1, %v1561_v56  ;;  %2220 = vmatprep.mubr.msk.bf16.mxu1 %vm569_vm1, %v1230_v58 }
  0x7b   : > { %2256 = vmatprep.mubr.msk.bf16.mxu0 %vm569_vm1, %v1668_v30 }
  0x82   : > { %2257 = vmatmul.mubr.msk.bf16.vlgmr.msra.gmra.mrb[0].mxu0 %vm569_vm1, %v1669_v8 }
  0x83   : > { %2260 = vmatprep.mubr.msk.bf16.mxu0 %vm569_vm1, %v1670_v15 }
  0x85   : > { %2221 = vmatmul.mubr.msk.bf16.vlgmr.msra.gmra.mrb[4].mxu1 %vm569_vm1, %v1231_v33 }
  0x8a   : > { %2261 = vmatmul.mubr.msk.bf16.gmra.mrb[4].mxu0 %vm569_vm1, %v1671_v36 }
 0x144   : > { %v2208_v9 = vpop.f32.mrb[0].mxu1 }
 0x145   : > { %v1173_v26 = vpop.f32.mrb[1].mxu1 }
 0x146   : > { %v2209_v37 = vpop.f32.mrb[2].mxu1 }
 0x147   : > { %v1176_v38 = vpop.f32.mrb[3].mxu1 }
 0x155   : > { %v2258_v42 = vpop.f32.mrb[0].mxu0 }
 0x156   : > { %v2266_v45 = vadd.f32 %v2258_v42, %v2208_v9  ;;  %v1723_v49 = vpop.f32.mrb[1].mxu0 }
 0x157   : > { %v2267_v52 = vadd.f32 %v1723_v49, %v1173_v26  ;;  %v2259_v53 = vpop.f32.mrb[2].mxu0 }
 0x158   : > { %v1771_v55 = vadd.f32 %v2266_v45, %v2106_v43  ;;  %v2268_v13 = vadd.f32 %v2259_v53, %v2209_v37  ;;  %v1726_v57 = vpop.f32.mrb[3].mxu0  ;;  %v2222_v59 = vpop.f32.mrb[4].mxu1 }
 0x159   : > { %v1769_v23 = vadd.f32 %v2267_v52, %v2106_v43  ;;  %v2269_v20 = vadd.f32 %v1726_v57, %v1176_v38  ;;  %v1299_v60 = vpop.f32.mrb[5].mxu1 }
 0x15a   : > { %v1786_v61 = vmul.f32 %v2865_v50, %v1771_v55  ;;  %v1772_v62 = vadd.f32 %v2268_v13, %v2106_v43  ;;  %v2223_v28 = vpop.f32.mrb[6].mxu1 }
 0x15b   : > { %v1784_v39 = vmul.f32 %v2865_v50, %v1769_v23  ;;  %v1770_v63 = vadd.f32 %v2269_v20, %v2106_v43  ;;  %v1302_v0 = vpop.f32.mrb[7].mxu1 }
 0x15c   : > { %v1801_v4 = vadd.f32 %v2870_v5, %v1786_v61  ;;  %v1787_v6 = vmul.f32 %v2865_v50, %v1772_v62 }
 0x15d   : > { %v1799_v12 = vadd.f32 %v2870_v5, %v1784_v39  ;;  %v1785_v14 = vmul.f32 %v2865_v50, %v1770_v63  ;;  %v2262_v16 = vpop.f32.mrb[4].mxu0 }
 0x15e   : > { %vm1809_vm1 = vcmp.ge.f32.partialorder %v1801_v4, 0.0  ;;  %v1817_v40 = vmul.f32 0.1, %v1801_v4  ;;  %v1802_v44 = vadd.f32 %v2870_v5, %v1787_v6  ;;  %v2270_v17 = vadd.f32 %v2262_v16, %v2222_v59  ;;  %v1739_v19 = vpop.f32.mrb[5].mxu0 }
 0x15f   : > { %vm1807_vm2 = vcmp.ge.f32.partialorder %v1799_v12, 0.0  ;;  %v1815_v21 = vmul.f32 0.1, %v1799_v12  ;;  %v1800_v1 = vadd.f32 %v2870_v5, %v1785_v14  ;;  %v2271_v22 = vadd.f32 %v1739_v19, %v1299_v60  ;;  %v2263_v24 = vpop.f32.mrb[6].mxu0 }
 0x160   : > { %v1825_v25 = vsel %vm1809_vm1, %v1801_v4, %v1817_v40  ;;  %vm1810_vm3 = vcmp.ge.f32.partialorder %v1802_v44, 0.0  ;;  %v1818_v54 = vmul.f32 0.1, %v1802_v44  ;;  %v1775_v7 = vadd.f32 %v2270_v17, %v2106_v43  ;;  %v1742_v41 = vpop.f32.mrb[7].mxu0 }
 0x161   : > { %v2123_v46 = vpack.c.bf16 %v1825_v25, %v1825_v25  ;;  %v1823_v47 = vsel %vm1807_vm2, %v1799_v12, %v1815_v21  ;;  %vm1808_vm12 = vcmp.ge.f32.partialorder %v1800_v1, 0.0  ;;  %v1816_v51 = vmul.f32 0.1, %v1800_v1 }
 0x162   : > { %v2121_v18 = vpack.c.bf16 %v1823_v47, %v1823_v47  ;;  %v1826_v27 = vsel %vm1810_vm3, %v1802_v44, %v1818_v54  ;;  %v1790_v48 = vmul.f32 %v2865_v50, %v1775_v7  ;;  %v1773_v29 = vadd.f32 %v2271_v22, %v2106_v43 }
 0x163   : > { %1866 = vst.msk [vmem:[%s2884_s20 + $0x8] sm:$0xf] %vm1863_vm0, %v2123_v46  ;;  %v2124_v56 = vpack.c.bf16 %v1826_v27, %v1826_v27  ;;  %v1824_v58 = vsel %vm1808_vm12, %v1800_v1, %v1816_v51  ;;  %v2272_v30 = vadd.f32 %v2263_v24, %v2223_v28  ;;  %v2273_v3 = vadd.f32 %v1742_v41, %v1302_v0 }
 0x164   : > { %1864 = vst.msk [vmem:[%s2884_s20] sm:$0xf] %vm1863_vm0, %v2121_v18  ;;  %v2122_v31 = vpack.c.bf16 %v1824_v58, %v1824_v58  ;;  %v1805_v32 = vadd.f32 %v2870_v5, %v1790_v48  ;;  %v1788_v2 = vmul.f32 %v2865_v50, %v1773_v29 }
 0x165   : > { %1867 = vst.msk [vmem:[%s2884_s20 + $0xc] sm:$0xf] %vm1863_vm0, %v2124_v56  ;;  %v1776_v8 = vadd.f32 %v2272_v30, %v2106_v43  ;;  %v1774_v11 = vadd.f32 %v2273_v3, %v2106_v43 }
 0x166   : > { %1865 = vst.msk [vmem:[%s2884_s20 + $0x4] sm:$0xf] %vm1863_vm0, %v2122_v31  ;;  %vm1813_vm13 = vcmp.ge.f32.partialorder %v1805_v32, 0.0  ;;  %v1821_v10 = vmul.f32 0.1, %v1805_v32  ;;  %v1803_v15 = vadd.f32 %v2870_v5, %v1788_v2 }
 0x167   : > { %v1791_v33 = vmul.f32 %v2865_v50, %v1776_v8  ;;  %v1789_v34 = vmul.f32 %v2865_v50, %v1774_v11 }
 0x168   : > { %v1829_v35 = vsel %vm1813_vm13, %v1805_v32, %v1821_v10  ;;  %vm1811_vm14 = vcmp.ge.f32.partialorder %v1803_v15, 0.0  ;;  %v1819_v36 = vmul.f32 0.1, %v1803_v15 }
 0x169   : > { %v2127_v9 = vpack.c.bf16 %v1829_v35, %v1829_v35  ;;  %v1806_v26 = vadd.f32 %v2870_v5, %v1791_v33  ;;  %v1804_v37 = vadd.f32 %v2870_v5, %v1789_v34 }
 0x16a   : > { %v1827_v38 = vsel %vm1811_vm14, %v1803_v15, %v1819_v36 }
 0x16b   : > { %1870 = vst.msk [vmem:[%s2884_s20 + $0x18] sm:$0xf] %vm1863_vm0, %v2127_v9  ;;  %v2125_v42 = vpack.c.bf16 %v1827_v38, %v1827_v38  ;;  %vm1814_vm15 = vcmp.ge.f32.partialorder %v1806_v26, 0.0  ;;  %v1822_v43 = vmul.f32 0.1, %v1806_v26  ;;  %vm1812_vm4 = vcmp.ge.f32.partialorder %v1804_v37, 0.0 }
 0x16c   : > { %v1820_v45 = vmul.f32 0.1, %v1804_v37 }
 0x16d   : > { %1868 = vst.msk [vmem:[%s2884_s20 + $0x10] sm:$0xf] %vm1863_vm0, %v2125_v42  ;;  %v1830_v49 = vsel %vm1814_vm15, %v1806_v26, %v1822_v43 }
 0x16e   : > { %v2128_v50 = vpack.c.bf16 %v1830_v49, %v1830_v49  ;;  %v1828_v52 = vsel %vm1812_vm4, %v1804_v37, %v1820_v45 }
 0x16f   : > { %v2126_v53 = vpack.c.bf16 %v1828_v52, %v1828_v52 }
 0x170   : > { %1871 = vst.msk [vmem:[%s2884_s20 + $0x1c] sm:$0xf] %vm1863_vm0, %v2128_v50 }
 0x171   : > { %1869 = vst.msk [vmem:[%s2884_s20 + $0x14] sm:$0xf] %vm1863_vm0, %v2126_v53 }
 0x172 PF: > { %s17_s26 = sadd.s32 1, %s2387_s26   ;;  %s2927_s24 = smov %s2383_s25 }
 0x173   : > { %p14_p5 = scmp.ge.s32.totalorder %s17_s26, 4   ;;  %s2928_s25 = smov %s2930_s27 }
 0x175   :  { %16 = sbr.rel (!%p14_p5) target bundleno = 2 (0x2), region = 175 }

</bundles_post_ra>
